<compile_context>
chip_gen: v6e
topology: v6e:2x2x1
jax: 0.10.0
libtpu: 0.0.40
codegen_flags: <defaults>
</compile_context>

<pallas_src>
import jax
import jax.numpy as jnp
from jax.experimental import pallas as pl
from jax.experimental.pallas import tpu as pltpu


_NEG_INF = -1e30


def _round_up(x, m):
    return ((x + m - 1) // m) * m


def _make_game_network_kernel(num_chunks, chunk_rows):
    """Kernel factory: the batch tile is processed as `num_chunks` independent
    sub-chunks of `chunk_rows` rows so the scheduler can interleave their
    matmul chains (hides MXU result-drain latency on v5e/v6e)."""

    def kernel(
        x_ref,
        w1_ref, b1_ref,
        w2_ref, b2_ref,
        w3_ref, b3_ref,
        wpv_ref, bpv_ref,
        wpo_ref, bpo_ref,
        wvo_ref, bvo_ref,
        policy_ref, value_ref,
    ):
        # Hoist parameter loads out of the chunk loop.
        w1 = w1_ref[...]
        b1 = b1_ref[...]
        w2 = w2_ref[...]
        b2 = b2_ref[...]
        w3 = w3_ref[...]
        b3 = b3_ref[...]
        wpv = wpv_ref[...]
        bpv = bpv_ref[...]
        wpo = wpo_ref[...]
        bpo = bpo_ref[...]
        wvo = wvo_ref[...]
        bvo = bvo_ref[0]

        for c in range(num_chunks):
            r0 = c * chunk_rows
            x = x_ref[pl.ds(r0, chunk_rows), :]                         # (rows, S2P) bf16

            # Shared trunk: fc1 -> relu -> fc2 -> relu -> fc3 -> relu
            # (bf16 MXU operands, f32 accumulation).
            h = jnp.dot(x, w1, preferred_element_type=jnp.float32) + b1
            h = jnp.maximum(h, 0.0).astype(jnp.bfloat16)
            h = jnp.dot(h, w2, preferred_element_type=jnp.float32) + b2
            h = jnp.maximum(h, 0.0).astype(jnp.bfloat16)
            h = jnp.dot(h, w3, preferred_element_type=jnp.float32) + b3
            h = jnp.maximum(h, 0.0).astype(jnp.bfloat16)

            # Fused heads: policy_fc1 (->256) and value_fc1 (->128) as one 256->384 matmul.
            pv = jnp.dot(h, wpv, preferred_element_type=jnp.float32) + bpv
            pv = jnp.maximum(pv, 0.0)
            p = pv[:, :256].astype(jnp.bfloat16)                        # policy branch
            v = pv[:, 256:]                                             # value branch (f32)

            # Policy head: linear -> softmax over the lane-padded move dim.
            # Padded columns carry a -1e30 f32 bias -> exp underflows to exactly 0.
            logits = jnp.dot(p, wpo, preferred_element_type=jnp.float32) + bpo
            m = jnp.max(logits, axis=-1, keepdims=True)
            e = jnp.exp(logits - m)
            inv = pl.reciprocal(jnp.sum(e, axis=-1, keepdims=True), approx=True)
            policy_ref[pl.ds(r0, chunk_rows), :] = (e * inv).astype(policy_ref.dtype)

            # Value head: 128 -> 1 as broadcast-multiply + lane reduction (no N=1 MXU pass).
            val = jnp.sum(v * wvo, axis=-1, keepdims=True) + bvo
            value_ref[pl.ds(r0, chunk_rows), :] = jnp.tanh(val)

    return kernel


def _xavier_normal_t(key, in_f, out_f):
    # PyTorch xavier_normal_ on a (out, in) weight; return the (in, out) transpose.
    std = (2.0 / (in_f + out_f)) ** 0.5
    w = jax.random.normal(key, (out_f, in_f), dtype=jnp.float32) * std
    return w.T


def init_game_network_params(board_size, key):
    """Packed, kernel-ready params matching GameNetwork.__init__ (xavier weights, zero biases)."""
    s2 = board_size * board_size
    s2p = _round_up(s2, 128)

    keys = jax.random.split(key, 7)
    w_fc1 = _xavier_normal_t(keys[0], s2, 256)           # (s2, 256)
    w_fc2 = _xavier_normal_t(keys[1], 256, 512)
    w_fc3 = _xavier_normal_t(keys[2], 512, 256)
    w_pfc1 = _xavier_normal_t(keys[3], 256, 256)
    w_pout = _xavier_normal_t(keys[4], 256, s2)
    w_vfc1 = _xavier_normal_t(keys[5], 256, 128)
    w_vout = _xavier_normal_t(keys[6], 128, 1)           # (128, 1)

    # fc1: zero-pad contraction dim to the lane-padded input width (no math change).
    w1 = jnp.pad(w_fc1, ((0, s2p - s2), (0, 0))).astype(jnp.bfloat16)
    b1 = jnp.zeros((1, 256), jnp.float32)
    w2 = w_fc2.astype(jnp.bfloat16)
    b2 = jnp.zeros((1, 512), jnp.float32)
    w3 = w_fc3.astype(jnp.bfloat16)
    b3 = jnp.zeros((1, 256), jnp.float32)

    # Fused policy_fc1 / value_fc1: (256, 256+128) = (256, 384).
    wpv = jnp.concatenate([w_pfc1, w_vfc1], axis=1).astype(jnp.bfloat16)
    bpv = jnp.zeros((1, 384), jnp.float32)

    # policy_out padded to a lane-dense (multiple-of-128) output; padded logits -> -inf-like.
    # The -1e30 bias MUST stay f32 (bf16 policy output is cast only at the final store).
    wpo = jnp.pad(w_pout, ((0, 0), (0, s2p - s2))).astype(jnp.bfloat16)
    bpo = jnp.concatenate(
        [jnp.zeros((1, s2), jnp.float32),
         jnp.full((1, s2p - s2), _NEG_INF, jnp.float32)], axis=1)

    # value_out as a broadcast row for the in-kernel lane reduction; scalar bias for SMEM.
    wvo = w_vout.T.astype(jnp.float32)                   # (1, 128)
    bvo = jnp.zeros((1,), jnp.float32)

    return dict(w1=w1, b1=b1, w2=w2, b2=b2, w3=w3, b3=b3,
                wpv=wpv, bpv=bpv, wpo=wpo, bpo=bpo, wvo=wvo, bvo=bvo)


def game_network_forward(x, params, board_size, *, batch_tile=None):
    """x: (batch, board, board) -> (policy (batch, board*board) f32, value (batch, 1) f32)."""
    s2 = board_size * board_size
    s2p = _round_up(s2, 128)

    x2 = x.reshape(-1, s2).astype(jnp.float32)           # x.view(-1, S*S)
    B = x2.shape[0]

    # Bigger batch tiles amortize MXU push/drain and per-grid-step overhead;
    # weights are VMEM-resident so per-row cost is pure compute.
    if batch_tile is None:
        batch_tile = 1024 if B >= 4096 else 512

    tb = min(batch_tile, _round_up(max(B, 1), 8))
    # v7x dual-TensorCore: guarantee >= 2 grid steps when there is enough work,
    # so dimension_semantics=("parallel",) can shard the batch across both cores.
    if _round_up(B, tb) // tb == 1 and B > 8:
        tb = min(batch_tile, _round_up(-(-B // 2), 8))
    Bp = _round_up(B, tb)

    xp = jnp.pad(x2, ((0, Bp - B), (0, s2p - s2))).astype(jnp.bfloat16)

    # Split the tile into 2 independent sub-chunks when it is big enough
    # (keeps MXU push slots busy while the other chunk's epilogue runs on the VPU).
    num_chunks = 2 if (tb >= 32 and tb % 16 == 0) else 1
    chunk_rows = tb // num_chunks
    kernel = _make_game_network_kernel(num_chunks, chunk_rows)

    grid = (Bp // tb,)

    p_ = params
    inputs = (xp,
              p_["w1"], p_["b1"], p_["w2"], p_["b2"], p_["w3"], p_["b3"],
              p_["wpv"], p_["bpv"], p_["wpo"], p_["bpo"], p_["wvo"], p_["bvo"])

    weight_bytes = sum(int(a.size) * a.dtype.itemsize for a in inputs[1:])
    flops = 2 * Bp * (s2p * 256 + 256 * 512 + 512 * 256 + 256 * 384 + 256 * s2p + 128)
    cost = pl.CostEstimate(
        flops=int(flops),
        transcendentals=int(Bp * (s2p + 2)),
        bytes_accessed=int(weight_bytes
                           + int(xp.size) * xp.dtype.itemsize
                           + Bp * s2p * 2          # bf16 policy writeback
                           + Bp * 4),
    )

    def run(single_buffer_weights):
        def tile_spec(n_lanes):
            return pl.BlockSpec((tb, n_lanes), lambda i: (i, 0))

        def resident_spec(shape):
            idx = lambda i: (0,) * len(shape)
            if single_buffer_weights:
                # Block index never changes -> second pipeline buffer is dead VMEM.
                return pl.BlockSpec(shape, idx, pipeline_mode=pl.Buffered(1))
            return pl.BlockSpec(shape, idx)

        in_specs = [tile_spec(s2p)]
        for arr in inputs[1:-1]:
            in_specs.append(resident_spec(arr.shape))
        in_specs.append(pl.BlockSpec(memory_space=pltpu.MemorySpace.SMEM))  # scalar value bias

        return pl.pallas_call(
            kernel,
            grid=grid,
            in_specs=in_specs,
            out_specs=(tile_spec(s2p), pl.BlockSpec((tb, 1), lambda i: (i, 0))),
            out_shape=(
                jax.ShapeDtypeStruct((Bp, s2p), jnp.bfloat16),   # bf16 policy writeback
                jax.ShapeDtypeStruct((Bp, 1), jnp.float32),
            ),
            compiler_params=pltpu.CompilerParams(
                dimension_semantics=("parallel",),
                vmem_limit_bytes=32 * 1024 * 1024),
            cost_estimate=cost,
        )(*inputs)

    try:
        policy_pad, value = run(single_buffer_weights=True)
    except Exception:
        # Fallback if this JAX build rejects pl.Buffered(1) on resident inputs.
        policy_pad, value = run(single_buffer_weights=False)

    policy = policy_pad[:B, :s2].astype(jnp.float32)
    return policy, value[:B]


def _reference_forward(x, params, board_size):
    """Plain-JAX f32 reference using the same packed (bf16-rounded) parameters."""
    s2 = board_size * board_size
    s2p = _round_up(s2, 128)
    x2 = x.reshape(-1, s2).astype(jnp.float32)
    xp = jnp.pad(x2, ((0, 0), (0, s2p - s2)))

    h = jax.nn.relu(xp @ params["w1"].astype(jnp.float32) + params["b1"])
    h = jax.nn.relu(h @ params["w2"].astype(jnp.float32) + params["b2"])
    h = jax.nn.relu(h @ params["w3"].astype(jnp.float32) + params["b3"])
    pv = jax.nn.relu(h @ params["wpv"].astype(jnp.float32) + params["bpv"])
    p, v = pv[:, :256], pv[:, 256:]
    logits = p @ params["wpo"].astype(jnp.float32) + params["bpo"]
    policy = jax.nn.softmax(logits[:, :s2], axis=-1)
    value = jnp.tanh(jnp.sum(v * params["wvo"], axis=-1, keepdims=True) + params["bvo"][0])
    return policy, value


if __name__ == "__main__":
    board_size = 8
    key = jax.random.PRNGKey(0)
    k_params, k_x1, k_x2 = jax.random.split(key, 3)

    params = init_game_network_params(board_size, k_params)

    # Small canonical case (batch=2): single grid step, single sub-chunk.
    x_small = jax.random.randint(
        k_x1, (2, board_size, board_size), -1, 2).astype(jnp.float32)
    policy, value = game_network_forward(x_small, params, board_size)
    policy, value = jax.block_until_ready((policy, value))

    assert policy.shape == (2, board_size * board_size)
    assert value.shape == (2, 1)
    assert jnp.allclose(jnp.sum(policy, axis=1), 1.0, atol=2e-2)
    assert jnp.all(jnp.abs(value) <= 1.0)

    ref_policy, ref_value = _reference_forward(x_small, params, board_size)
    assert jnp.allclose(policy, ref_policy, atol=5e-2)
    assert jnp.allclose(value, ref_value, atol=5e-2)

    # Larger case: exercises the >=2-grid-step path (dual-TC on v7x) and the
    # 2-sub-chunk interleaved kernel body.
    x_big = jax.random.randint(
        k_x2, (64, board_size, board_size), -1, 2).astype(jnp.float32)
    policy_b, value_b = game_network_forward(x_big, params, board_size)
    policy_b, value_b = jax.block_until_ready((policy_b, value_b))

    ref_policy_b, ref_value_b = _reference_forward(x_big, params, board_size)
    assert policy_b.shape == (64, board_size * board_size)
    assert value_b.shape == (64, 1)
    assert jnp.allclose(jnp.sum(policy_b, axis=1), 1.0, atol=2e-2)
    assert jnp.allclose(policy_b, ref_policy_b, atol=5e-2)
    assert jnp.allclose(value_b, ref_value_b, atol=5e-2)

    print("KERNEL_OK")
</pallas_src>

<mosaic_0001>
module attributes {stable_mosaic.version = 11 : i64} {
  func.func @kernel(%arg0: i32, %arg1: memref<8x128xbf16, #tpu.memory_space<vmem>>, %arg2: memref<128x256xbf16, #tpu.memory_space<vmem>>, %arg3: memref<1x256xf32, #tpu.memory_space<vmem>>, %arg4: memref<256x512xbf16, #tpu.memory_space<vmem>>, %arg5: memref<1x512xf32, #tpu.memory_space<vmem>>, %arg6: memref<512x256xbf16, #tpu.memory_space<vmem>>, %arg7: memref<1x256xf32, #tpu.memory_space<vmem>>, %arg8: memref<256x384xbf16, #tpu.memory_space<vmem>>, %arg9: memref<1x384xf32, #tpu.memory_space<vmem>>, %arg10: memref<256x128xbf16, #tpu.memory_space<vmem>>, %arg11: memref<1x128xf32, #tpu.memory_space<vmem>>, %arg12: memref<1x128xf32, #tpu.memory_space<vmem>>, %arg13: memref<1xf32, #tpu.memory_space<smem>>, %arg14: memref<8x128xbf16, #tpu.memory_space<vmem>>, %arg15: memref<8x1xf32, #tpu.memory_space<vmem>>) attributes {dimension_semantics = [#tpu.dimension_semantics<parallel>], iteration_bounds = array<i64: 1>, scalar_prefetch = 0 : i64, scratch_operands = 0 : i64, tpu.core_type = #tpu.core_type<tc>, window_params = [{transform_indices = @transform_0, window_bounds = array<i64: 8, 128>}, {pipeline_mode = #tpu.pipeline_mode<synchronous>, transform_indices = @transform_1, window_bounds = array<i64: 128, 256>}, {pipeline_mode = #tpu.pipeline_mode<synchronous>, transform_indices = @transform_2, window_bounds = array<i64: 1, 256>}, {pipeline_mode = #tpu.pipeline_mode<synchronous>, transform_indices = @transform_3, window_bounds = array<i64: 256, 512>}, {pipeline_mode = #tpu.pipeline_mode<synchronous>, transform_indices = @transform_4, window_bounds = array<i64: 1, 512>}, {pipeline_mode = #tpu.pipeline_mode<synchronous>, transform_indices = @transform_5, window_bounds = array<i64: 512, 256>}, {pipeline_mode = #tpu.pipeline_mode<synchronous>, transform_indices = @transform_6, window_bounds = array<i64: 1, 256>}, {pipeline_mode = #tpu.pipeline_mode<synchronous>, transform_indices = @transform_7, window_bounds = array<i64: 256, 384>}, {pipeline_mode = #tpu.pipeline_mode<synchronous>, transform_indices = @transform_8, window_bounds = array<i64: 1, 384>}, {pipeline_mode = #tpu.pipeline_mode<synchronous>, transform_indices = @transform_9, window_bounds = array<i64: 256, 128>}, {pipeline_mode = #tpu.pipeline_mode<synchronous>, transform_indices = @transform_10, window_bounds = array<i64: 1, 128>}, {pipeline_mode = #tpu.pipeline_mode<synchronous>, transform_indices = @transform_11, window_bounds = array<i64: 1, 128>}, {transform_indices = @transform_12, window_bounds = array<i64: 1>}, {transform_indices = @transform_13, window_bounds = array<i64: 8, 128>}, {transform_indices = @transform_14, window_bounds = array<i64: 8, 1>}]} {
    %c0 = arith.constant 0 : index
    %c0_0 = arith.constant 0 : index
    %0 = vector.load %arg2[%c0, %c0_0] : memref<128x256xbf16, #tpu.memory_space<vmem>>, vector<128x256xbf16>
    %c0_1 = arith.constant 0 : index
    %c0_2 = arith.constant 0 : index
    %1 = vector.load %arg3[%c0_1, %c0_2] : memref<1x256xf32, #tpu.memory_space<vmem>>, vector<1x256xf32>
    %c0_3 = arith.constant 0 : index
    %c0_4 = arith.constant 0 : index
    %2 = vector.load %arg4[%c0_3, %c0_4] : memref<256x512xbf16, #tpu.memory_space<vmem>>, vector<256x512xbf16>
    %c0_5 = arith.constant 0 : index
    %c0_6 = arith.constant 0 : index
    %3 = vector.load %arg5[%c0_5, %c0_6] : memref<1x512xf32, #tpu.memory_space<vmem>>, vector<1x512xf32>
    %c0_7 = arith.constant 0 : index
    %c0_8 = arith.constant 0 : index
    %4 = vector.load %arg6[%c0_7, %c0_8] : memref<512x256xbf16, #tpu.memory_space<vmem>>, vector<512x256xbf16>
    %c0_9 = arith.constant 0 : index
    %c0_10 = arith.constant 0 : index
    %5 = vector.load %arg7[%c0_9, %c0_10] : memref<1x256xf32, #tpu.memory_space<vmem>>, vector<1x256xf32>
    %c0_11 = arith.constant 0 : index
    %c0_12 = arith.constant 0 : index
    %6 = vector.load %arg8[%c0_11, %c0_12] : memref<256x384xbf16, #tpu.memory_space<vmem>>, vector<256x384xbf16>
    %c0_13 = arith.constant 0 : index
    %c0_14 = arith.constant 0 : index
    %7 = vector.load %arg9[%c0_13, %c0_14] : memref<1x384xf32, #tpu.memory_space<vmem>>, vector<1x384xf32>
    %c0_15 = arith.constant 0 : index
    %c0_16 = arith.constant 0 : index
    %8 = vector.load %arg10[%c0_15, %c0_16] : memref<256x128xbf16, #tpu.memory_space<vmem>>, vector<256x128xbf16>
    %c0_17 = arith.constant 0 : index
    %c0_18 = arith.constant 0 : index
    %9 = vector.load %arg11[%c0_17, %c0_18] : memref<1x128xf32, #tpu.memory_space<vmem>>, vector<1x128xf32>
    %c0_19 = arith.constant 0 : index
    %c0_20 = arith.constant 0 : index
    %10 = vector.load %arg12[%c0_19, %c0_20] : memref<1x128xf32, #tpu.memory_space<vmem>>, vector<1x128xf32>
    %c0_21 = arith.constant 0 : index
    %11 = memref.load %arg13[%c0_21] : memref<1xf32, #tpu.memory_space<smem>>
    %c0_22 = arith.constant 0 : index
    %c0_23 = arith.constant 0 : index
    %12 = vector.load %arg1[%c0_22, %c0_23] : memref<8x128xbf16, #tpu.memory_space<vmem>>, vector<8x128xbf16>
    %cst = arith.constant dense<0.000000e+00> : vector<8x256xf32>
    %13 = tpu.matmul %12, %0, %cst {dimension_numbers = #tpu.dot_dimension_numbers<[1], [0], [0], [1], [0, 0, 1, 1], [], []>} : vector<8x128xbf16>, vector<128x256xbf16>, vector<8x256xf32> -> vector<8x256xf32>
    %14 = vector.broadcast %1 : vector<1x256xf32> to vector<8x256xf32>
    %15 = arith.addf %13, %14 : vector<8x256xf32>
    %cst_24 = arith.constant 0.000000e+00 : f32
    %16 = vector.broadcast %cst_24 : f32 to vector<8x256xf32>
    %17 = arith.maximumf %15, %16 : vector<8x256xf32>
    %18 = arith.truncf %17 : vector<8x256xf32> to vector<8x256xbf16>
    %cst_25 = arith.constant dense<0.000000e+00> : vector<8x512xf32>
    %19 = tpu.matmul %18, %2, %cst_25 {dimension_numbers = #tpu.dot_dimension_numbers<[1], [0], [0], [1], [0, 0, 1, 1], [], []>} : vector<8x256xbf16>, vector<256x512xbf16>, vector<8x512xf32> -> vector<8x512xf32>
    %20 = vector.broadcast %3 : vector<1x512xf32> to vector<8x512xf32>
    %21 = arith.addf %19, %20 : vector<8x512xf32>
    %cst_26 = arith.constant 0.000000e+00 : f32
    %22 = vector.broadcast %cst_26 : f32 to vector<8x512xf32>
    %23 = arith.maximumf %21, %22 : vector<8x512xf32>
    %24 = arith.truncf %23 : vector<8x512xf32> to vector<8x512xbf16>
    %cst_27 = arith.constant dense<0.000000e+00> : vector<8x256xf32>
    %25 = tpu.matmul %24, %4, %cst_27 {dimension_numbers = #tpu.dot_dimension_numbers<[1], [0], [0], [1], [0, 0, 1, 1], [], []>} : vector<8x512xbf16>, vector<512x256xbf16>, vector<8x256xf32> -> vector<8x256xf32>
    %26 = vector.broadcast %5 : vector<1x256xf32> to vector<8x256xf32>
    %27 = arith.addf %25, %26 : vector<8x256xf32>
    %cst_28 = arith.constant 0.000000e+00 : f32
    %28 = vector.broadcast %cst_28 : f32 to vector<8x256xf32>
    %29 = arith.maximumf %27, %28 : vector<8x256xf32>
    %30 = arith.truncf %29 : vector<8x256xf32> to vector<8x256xbf16>
    %cst_29 = arith.constant dense<0.000000e+00> : vector<8x384xf32>
    %31 = tpu.matmul %30, %6, %cst_29 {dimension_numbers = #tpu.dot_dimension_numbers<[1], [0], [0], [1], [0, 0, 1, 1], [], []>} : vector<8x256xbf16>, vector<256x384xbf16>, vector<8x384xf32> -> vector<8x384xf32>
    %32 = vector.broadcast %7 : vector<1x384xf32> to vector<8x384xf32>
    %33 = arith.addf %31, %32 : vector<8x384xf32>
    %cst_30 = arith.constant 0.000000e+00 : f32
    %34 = vector.broadcast %cst_30 : f32 to vector<8x384xf32>
    %35 = arith.maximumf %33, %34 : vector<8x384xf32>
    %36 = vector.extract_strided_slice %35 {offsets = [0, 0], sizes = [8, 256], strides = [1, 1]} : vector<8x384xf32> to vector<8x256xf32>
    %37 = arith.truncf %36 : vector<8x256xf32> to vector<8x256xbf16>
    %38 = vector.extract_strided_slice %35 {offsets = [0, 256], sizes = [8, 128], strides = [1, 1]} : vector<8x384xf32> to vector<8x128xf32>
    %cst_31 = arith.constant dense<0.000000e+00> : vector<8x128xf32>
    %39 = tpu.matmul %37, %8, %cst_31 {dimension_numbers = #tpu.dot_dimension_numbers<[1], [0], [0], [1], [0, 0, 1, 1], [], []>} : vector<8x256xbf16>, vector<256x128xbf16>, vector<8x128xf32> -> vector<8x128xf32>
    %40 = vector.broadcast %9 : vector<1x128xf32> to vector<8x128xf32>
    %41 = arith.addf %39, %40 : vector<8x128xf32>
    %cst_32 = arith.constant dense<0xFF800000> : vector<8xf32>
    %42 = vector.multi_reduction <maximumf>, %41, %cst_32 [1] : vector<8x128xf32> to vector<8xf32>
    %43 = vector.shape_cast %42 : vector<8xf32> to vector<8x1xf32>
    %44 = vector.broadcast %43 : vector<8x1xf32> to vector<8x128xf32>
    %45 = arith.subf %41, %44 : vector<8x128xf32>
    %46 = math.exp %45 : vector<8x128xf32>
    %cst_33 = arith.constant dense<0.000000e+00> : vector<8xf32>
    %47 = vector.multi_reduction <add>, %46, %cst_33 [1] : vector<8x128xf32> to vector<8xf32>
    %48 = vector.shape_cast %47 : vector<8xf32> to vector<8x1xf32>
    %49 = tpu.reciprocal %48 {approx = true} : vector<8x1xf32> -> vector<8x1xf32>
    %50 = vector.broadcast %49 : vector<8x1xf32> to vector<8x128xf32>
    %51 = arith.mulf %46, %50 : vector<8x128xf32>
    %52 = arith.truncf %51 : vector<8x128xf32> to vector<8x128xbf16>
    %c0_34 = arith.constant 0 : index
    %c0_35 = arith.constant 0 : index
    %53 = vector.load %arg14[%c0_34, %c0_35] : memref<8x128xbf16, #tpu.memory_space<vmem>>, vector<8x128xbf16>
    tpu.vector_store %arg14[%c0_34, %c0_35], %52 {strides = array<i32>} : memref<8x128xbf16, #tpu.memory_space<vmem>>, vector<8x128xbf16>,
    %54 = vector.broadcast %10 : vector<1x128xf32> to vector<8x128xf32>
    %55 = arith.mulf %38, %54 : vector<8x128xf32>
    %cst_36 = arith.constant dense<0.000000e+00> : vector<8xf32>
    %56 = vector.multi_reduction <add>, %55, %cst_36 [1] : vector<8x128xf32> to vector<8xf32>
    %57 = vector.shape_cast %56 : vector<8xf32> to vector<8x1xf32>
    %58 = vector.broadcast %11 : f32 to vector<8x1xf32>
    %59 = arith.addf %57, %58 : vector<8x1xf32>
    %60 = math.tanh %59 : vector<8x1xf32>
    %c0_37 = arith.constant 0 : index
    %c0_38 = arith.constant 0 : index
    %61 = vector.load %arg15[%c0_37, %c0_38] : memref<8x1xf32, #tpu.memory_space<vmem>>, vector<8x1xf32>
    tpu.vector_store %arg15[%c0_37, %c0_38], %60 {strides = array<i32>} : memref<8x1xf32, #tpu.memory_space<vmem>>, vector<8x1xf32>,
    return
  }
  func.func @transform_0(%arg0: i32) -> (i32, i32) {
    %c0_i32 = arith.constant 0 : i32
    %c0_i32_0 = arith.constant 0 : i32
    return %arg0, %c0_i32 : i32, i32
  }
  func.func @transform_1(%arg0: i32) -> (i32, i32) {
    %c0_i32 = arith.constant 0 : i32
    %c0_i32_0 = arith.constant 0 : i32
    %c0_i32_1 = arith.constant 0 : i32
    return %c0_i32, %c0_i32_0 : i32, i32
  }
  func.func @transform_2(%arg0: i32) -> (i32, i32) {
    %c0_i32 = arith.constant 0 : i32
    %c0_i32_0 = arith.constant 0 : i32
    %c0_i32_1 = arith.constant 0 : i32
    return %c0_i32, %c0_i32_0 : i32, i32
  }
  func.func @transform_3(%arg0: i32) -> (i32, i32) {
    %c0_i32 = arith.constant 0 : i32
    %c0_i32_0 = arith.constant 0 : i32
    %c0_i32_1 = arith.constant 0 : i32
    return %c0_i32, %c0_i32_0 : i32, i32
  }
  func.func @transform_4(%arg0: i32) -> (i32, i32) {
    %c0_i32 = arith.constant 0 : i32
    %c0_i32_0 = arith.constant 0 : i32
    %c0_i32_1 = arith.constant 0 : i32
    return %c0_i32, %c0_i32_0 : i32, i32
  }
  func.func @transform_5(%arg0: i32) -> (i32, i32) {
    %c0_i32 = arith.constant 0 : i32
    %c0_i32_0 = arith.constant 0 : i32
    %c0_i32_1 = arith.constant 0 : i32
    return %c0_i32, %c0_i32_0 : i32, i32
  }
  func.func @transform_6(%arg0: i32) -> (i32, i32) {
    %c0_i32 = arith.constant 0 : i32
    %c0_i32_0 = arith.constant 0 : i32
    %c0_i32_1 = arith.constant 0 : i32
    return %c0_i32, %c0_i32_0 : i32, i32
  }
  func.func @transform_7(%arg0: i32) -> (i32, i32) {
    %c0_i32 = arith.constant 0 : i32
    %c0_i32_0 = arith.constant 0 : i32
    %c0_i32_1 = arith.constant 0 : i32
    return %c0_i32, %c0_i32_0 : i32, i32
  }
  func.func @transform_8(%arg0: i32) -> (i32, i32) {
    %c0_i32 = arith.constant 0 : i32
    %c0_i32_0 = arith.constant 0 : i32
    %c0_i32_1 = arith.constant 0 : i32
    return %c0_i32, %c0_i32_0 : i32, i32
  }
  func.func @transform_9(%arg0: i32) -> (i32, i32) {
    %c0_i32 = arith.constant 0 : i32
    %c0_i32_0 = arith.constant 0 : i32
    %c0_i32_1 = arith.constant 0 : i32
    return %c0_i32, %c0_i32_0 : i32, i32
  }
  func.func @transform_10(%arg0: i32) -> (i32, i32) {
    %c0_i32 = arith.constant 0 : i32
    %c0_i32_0 = arith.constant 0 : i32
    %c0_i32_1 = arith.constant 0 : i32
    return %c0_i32, %c0_i32_0 : i32, i32
  }
  func.func @transform_11(%arg0: i32) -> (i32, i32) {
    %c0_i32 = arith.constant 0 : i32
    %c0_i32_0 = arith.constant 0 : i32
    %c0_i32_1 = arith.constant 0 : i32
    return %c0_i32, %c0_i32_0 : i32, i32
  }
  func.func @transform_12(%arg0: i32) -> i32 {
    %c0_i32 = arith.constant 0 : i32
    %c0_i32_0 = arith.constant 0 : i32
    return %c0_i32 : i32
  }
  func.func @transform_13(%arg0: i32) -> (i32, i32) {
    %c0_i32 = arith.constant 0 : i32
    %c0_i32_0 = arith.constant 0 : i32
    return %arg0, %c0_i32 : i32, i32
  }
  func.func @transform_14(%arg0: i32) -> (i32, i32) {
    %c0_i32 = arith.constant 0 : i32
    %c0_i32_0 = arith.constant 0 : i32
    return %arg0, %c0_i32 : i32, i32
  }
}

module attributes {stable_mosaic.version = 11 : i64} {
  func.func @kernel(%arg0: i32, %arg1: memref<8x128xbf16, #tpu.memory_space<vmem>>, %arg2: memref<128x256xbf16, #tpu.memory_space<vmem>>, %arg3: memref<1x256xf32, #tpu.memory_space<vmem>>, %arg4: memref<256x512xbf16, #tpu.memory_space<vmem>>, %arg5: memref<1x512xf32, #tpu.memory_space<vmem>>, %arg6: memref<512x256xbf16, #tpu.memory_space<vmem>>, %arg7: memref<1x256xf32, #tpu.memory_space<vmem>>, %arg8: memref<256x384xbf16, #tpu.memory_space<vmem>>, %arg9: memref<1x384xf32, #tpu.memory_space<vmem>>, %arg10: memref<256x128xbf16, #tpu.memory_space<vmem>>, %arg11: memref<1x128xf32, #tpu.memory_space<vmem>>, %arg12: memref<1x128xf32, #tpu.memory_space<vmem>>, %arg13: memref<1xf32, #tpu.memory_space<smem>>, %arg14: memref<8x128xbf16, #tpu.memory_space<vmem>>, %arg15: memref<8x1xf32, #tpu.memory_space<vmem>>) attributes {dimension_semantics = [#tpu.dimension_semantics<parallel>], iteration_bounds = array<i64: 1>, scalar_prefetch = 0 : i64, scratch_operands = 0 : i64, tpu.core_type = #tpu.core_type<tc>, window_params = [{transform_indices = @transform_0, window_bounds = array<i64: 8, 128>}, {pipeline_mode = #tpu.pipeline_mode<synchronous>, transform_indices = @transform_1, window_bounds = array<i64: 128, 256>}, {pipeline_mode = #tpu.pipeline_mode<synchronous>, transform_indices = @transform_2, window_bounds = array<i64: 1, 256>}, {pipeline_mode = #tpu.pipeline_mode<synchronous>, transform_indices = @transform_3, window_bounds = array<i64: 256, 512>}, {pipeline_mode = #tpu.pipeline_mode<synchronous>, transform_indices = @transform_4, window_bounds = array<i64: 1, 512>}, {pipeline_mode = #tpu.pipeline_mode<synchronous>, transform_indices = @transform_5, window_bounds = array<i64: 512, 256>}, {pipeline_mode = #tpu.pipeline_mode<synchronous>, transform_indices = @transform_6, window_bounds = array<i64: 1, 256>}, {pipeline_mode = #tpu.pipeline_mode<synchronous>, transform_indices = @transform_7, window_bounds = array<i64: 256, 384>}, {pipeline_mode = #tpu.pipeline_mode<synchronous>, transform_indices = @transform_8, window_bounds = array<i64: 1, 384>}, {pipeline_mode = #tpu.pipeline_mode<synchronous>, transform_indices = @transform_9, window_bounds = array<i64: 256, 128>}, {pipeline_mode = #tpu.pipeline_mode<synchronous>, transform_indices = @transform_10, window_bounds = array<i64: 1, 128>}, {pipeline_mode = #tpu.pipeline_mode<synchronous>, transform_indices = @transform_11, window_bounds = array<i64: 1, 128>}, {transform_indices = @transform_12, window_bounds = array<i64: 1>}, {transform_indices = @transform_13, window_bounds = array<i64: 8, 128>}, {transform_indices = @transform_14, window_bounds = array<i64: 8, 1>}]} {
    %c0 = arith.constant 0 : index
    %c0_0 = arith.constant 0 : index
    %0 = vector.load %arg2[%c0, %c0_0] : memref<128x256xbf16, #tpu.memory_space<vmem>>, vector<128x256xbf16>
    %c0_1 = arith.constant 0 : index
    %c0_2 = arith.constant 0 : index
    %1 = vector.load %arg3[%c0_1, %c0_2] : memref<1x256xf32, #tpu.memory_space<vmem>>, vector<1x256xf32>
    %c0_3 = arith.constant 0 : index
    %c0_4 = arith.constant 0 : index
    %2 = vector.load %arg4[%c0_3, %c0_4] : memref<256x512xbf16, #tpu.memory_space<vmem>>, vector<256x512xbf16>
    %c0_5 = arith.constant 0 : index
    %c0_6 = arith.constant 0 : index
    %3 = vector.load %arg5[%c0_5, %c0_6] : memref<1x512xf32, #tpu.memory_space<vmem>>, vector<1x512xf32>
    %c0_7 = arith.constant 0 : index
    %c0_8 = arith.constant 0 : index
    %4 = vector.load %arg6[%c0_7, %c0_8] : memref<512x256xbf16, #tpu.memory_space<vmem>>, vector<512x256xbf16>
    %c0_9 = arith.constant 0 : index
    %c0_10 = arith.constant 0 : index
    %5 = vector.load %arg7[%c0_9, %c0_10] : memref<1x256xf32, #tpu.memory_space<vmem>>, vector<1x256xf32>
    %c0_11 = arith.constant 0 : index
    %c0_12 = arith.constant 0 : index
    %6 = vector.load %arg8[%c0_11, %c0_12] : memref<256x384xbf16, #tpu.memory_space<vmem>>, vector<256x384xbf16>
    %c0_13 = arith.constant 0 : index
    %c0_14 = arith.constant 0 : index
    %7 = vector.load %arg9[%c0_13, %c0_14] : memref<1x384xf32, #tpu.memory_space<vmem>>, vector<1x384xf32>
    %c0_15 = arith.constant 0 : index
    %c0_16 = arith.constant 0 : index
    %8 = vector.load %arg10[%c0_15, %c0_16] : memref<256x128xbf16, #tpu.memory_space<vmem>>, vector<256x128xbf16>
    %c0_17 = arith.constant 0 : index
    %c0_18 = arith.constant 0 : index
    %9 = vector.load %arg11[%c0_17, %c0_18] : memref<1x128xf32, #tpu.memory_space<vmem>>, vector<1x128xf32>
    %c0_19 = arith.constant 0 : index
    %c0_20 = arith.constant 0 : index
    %10 = vector.load %arg12[%c0_19, %c0_20] : memref<1x128xf32, #tpu.memory_space<vmem>>, vector<1x128xf32>
    %c0_21 = arith.constant 0 : index
    %11 = memref.load %arg13[%c0_21] : memref<1xf32, #tpu.memory_space<smem>>
    %c0_22 = arith.constant 0 : index
    %c0_23 = arith.constant 0 : index
    %12 = vector.load %arg1[%c0_22, %c0_23] : memref<8x128xbf16, #tpu.memory_space<vmem>>, vector<8x128xbf16>
    %cst = arith.constant dense<0.000000e+00> : vector<8x256xf32>
    %13 = tpu.matmul %12, %0, %cst {dimension_numbers = #tpu.dot_dimension_numbers<[1], [0], [0], [1], [0, 0, 1, 1], [], []>} : vector<8x128xbf16>, vector<128x256xbf16>, vector<8x256xf32> -> vector<8x256xf32>
    %14 = vector.broadcast %1 : vector<1x256xf32> to vector<8x256xf32>
    %15 = arith.addf %13, %14 : vector<8x256xf32>
    %cst_24 = arith.constant 0.000000e+00 : f32
    %16 = vector.broadcast %cst_24 : f32 to vector<8x256xf32>
    %17 = arith.maximumf %15, %16 : vector<8x256xf32>
    %18 = arith.truncf %17 : vector<8x256xf32> to vector<8x256xbf16>
    %cst_25 = arith.constant dense<0.000000e+00> : vector<8x512xf32>
    %19 = tpu.matmul %18, %2, %cst_25 {dimension_numbers = #tpu.dot_dimension_numbers<[1], [0], [0], [1], [0, 0, 1, 1], [], []>} : vector<8x256xbf16>, vector<256x512xbf16>, vector<8x512xf32> -> vector<8x512xf32>
    %20 = vector.broadcast %3 : vector<1x512xf32> to vector<8x512xf32>
    %21 = arith.addf %19, %20 : vector<8x512xf32>
    %cst_26 = arith.constant 0.000000e+00 : f32
    %22 = vector.broadcast %cst_26 : f32 to vector<8x512xf32>
    %23 = arith.maximumf %21, %22 : vector<8x512xf32>
    %24 = arith.truncf %23 : vector<8x512xf32> to vector<8x512xbf16>
    %cst_27 = arith.constant dense<0.000000e+00> : vector<8x256xf32>
    %25 = tpu.matmul %24, %4, %cst_27 {dimension_numbers = #tpu.dot_dimension_numbers<[1], [0], [0], [1], [0, 0, 1, 1], [], []>} : vector<8x512xbf16>, vector<512x256xbf16>, vector<8x256xf32> -> vector<8x256xf32>
    %26 = vector.broadcast %5 : vector<1x256xf32> to vector<8x256xf32>
    %27 = arith.addf %25, %26 : vector<8x256xf32>
    %cst_28 = arith.constant 0.000000e+00 : f32
    %28 = vector.broadcast %cst_28 : f32 to vector<8x256xf32>
    %29 = arith.maximumf %27, %28 : vector<8x256xf32>
    %30 = arith.truncf %29 : vector<8x256xf32> to vector<8x256xbf16>
    %cst_29 = arith.constant dense<0.000000e+00> : vector<8x384xf32>
    %31 = tpu.matmul %30, %6, %cst_29 {dimension_numbers = #tpu.dot_dimension_numbers<[1], [0], [0], [1], [0, 0, 1, 1], [], []>} : vector<8x256xbf16>, vector<256x384xbf16>, vector<8x384xf32> -> vector<8x384xf32>
    %32 = vector.broadcast %7 : vector<1x384xf32> to vector<8x384xf32>
    %33 = arith.addf %31, %32 : vector<8x384xf32>
    %cst_30 = arith.constant 0.000000e+00 : f32
    %34 = vector.broadcast %cst_30 : f32 to vector<8x384xf32>
    %35 = arith.maximumf %33, %34 : vector<8x384xf32>
    %36 = vector.extract_strided_slice %35 {offsets = [0, 0], sizes = [8, 256], strides = [1, 1]} : vector<8x384xf32> to vector<8x256xf32>
    %37 = arith.truncf %36 : vector<8x256xf32> to vector<8x256xbf16>
    %38 = vector.extract_strided_slice %35 {offsets = [0, 256], sizes = [8, 128], strides = [1, 1]} : vector<8x384xf32> to vector<8x128xf32>
    %cst_31 = arith.constant dense<0.000000e+00> : vector<8x128xf32>
    %39 = tpu.matmul %37, %8, %cst_31 {dimension_numbers = #tpu.dot_dimension_numbers<[1], [0], [0], [1], [0, 0, 1, 1], [], []>} : vector<8x256xbf16>, vector<256x128xbf16>, vector<8x128xf32> -> vector<8x128xf32>
    %40 = vector.broadcast %9 : vector<1x128xf32> to vector<8x128xf32>
    %41 = arith.addf %39, %40 : vector<8x128xf32>
    %cst_32 = arith.constant dense<0xFF800000> : vector<8xf32>
    %42 = vector.multi_reduction <maximumf>, %41, %cst_32 [1] : vector<8x128xf32> to vector<8xf32>
    %43 = vector.shape_cast %42 : vector<8xf32> to vector<8x1xf32>
    %44 = vector.broadcast %43 : vector<8x1xf32> to vector<8x128xf32>
    %45 = arith.subf %41, %44 : vector<8x128xf32>
    %46 = math.exp %45 : vector<8x128xf32>
    %cst_33 = arith.constant dense<0.000000e+00> : vector<8xf32>
    %47 = vector.multi_reduction <add>, %46, %cst_33 [1] : vector<8x128xf32> to vector<8xf32>
    %48 = vector.shape_cast %47 : vector<8xf32> to vector<8x1xf32>
    %49 = tpu.reciprocal %48 {approx = true} : vector<8x1xf32> -> vector<8x1xf32>
    %50 = vector.broadcast %49 : vector<8x1xf32> to vector<8x128xf32>
    %51 = arith.mulf %46, %50 : vector<8x128xf32>
    %52 = arith.truncf %51 : vector<8x128xf32> to vector<8x128xbf16>
    %c0_34 = arith.constant 0 : index
    %c0_35 = arith.constant 0 : index
    %53 = vector.load %arg14[%c0_34, %c0_35] : memref<8x128xbf16, #tpu.memory_space<vmem>>, vector<8x128xbf16>
    tpu.vector_store %arg14[%c0_34, %c0_35], %52 {strides = array<i32>} : memref<8x128xbf16, #tpu.memory_space<vmem>>, vector<8x128xbf16>,
    %54 = vector.broadcast %10 : vector<1x128xf32> to vector<8x128xf32>
    %55 = arith.mulf %38, %54 : vector<8x128xf32>
    %cst_36 = arith.constant dense<0.000000e+00> : vector<8xf32>
    %56 = vector.multi_reduction <add>, %55, %cst_36 [1] : vector<8x128xf32> to vector<8xf32>
    %57 = vector.shape_cast %56 : vector<8xf32> to vector<8x1xf32>
    %58 = vector.broadcast %11 : f32 to vector<8x1xf32>
    %59 = arith.addf %57, %58 : vector<8x1xf32>
    %60 = math.tanh %59 : vector<8x1xf32>
    %c0_37 = arith.constant 0 : index
    %c0_38 = arith.constant 0 : index
    %61 = vector.load %arg15[%c0_37, %c0_38] : memref<8x1xf32, #tpu.memory_space<vmem>>, vector<8x1xf32>
    tpu.vector_store %arg15[%c0_37, %c0_38], %60 {strides = array<i32>} : memref<8x1xf32, #tpu.memory_space<vmem>>, vector<8x1xf32>,
    return
  }
  func.func @transform_0(%arg0: i32) -> (i32, i32) {
    %c0_i32 = arith.constant 0 : i32
    %c0_i32_0 = arith.constant 0 : i32
    return %arg0, %c0_i32 : i32, i32
  }
  func.func @transform_1(%arg0: i32) -> (i32, i32) {
    %c0_i32 = arith.constant 0 : i32
    %c0_i32_0 = arith.constant 0 : i32
    %c0_i32_1 = arith.constant 0 : i32
    return %c0_i32, %c0_i32_0 : i32, i32
  }
  func.func @transform_2(%arg0: i32) -> (i32, i32) {
    %c0_i32 = arith.constant 0 : i32
    %c0_i32_0 = arith.constant 0 : i32
    %c0_i32_1 = arith.constant 0 : i32
    return %c0_i32, %c0_i32_0 : i32, i32
  }
  func.func @transform_3(%arg0: i32) -> (i32, i32) {
    %c0_i32 = arith.constant 0 : i32
    %c0_i32_0 = arith.constant 0 : i32
    %c0_i32_1 = arith.constant 0 : i32
    return %c0_i32, %c0_i32_0 : i32, i32
  }
  func.func @transform_4(%arg0: i32) -> (i32, i32) {
    %c0_i32 = arith.constant 0 : i32
    %c0_i32_0 = arith.constant 0 : i32
    %c0_i32_1 = arith.constant 0 : i32
    return %c0_i32, %c0_i32_0 : i32, i32
  }
  func.func @transform_5(%arg0: i32) -> (i32, i32) {
    %c0_i32 = arith.constant 0 : i32
    %c0_i32_0 = arith.constant 0 : i32
    %c0_i32_1 = arith.constant 0 : i32
    return %c0_i32, %c0_i32_0 : i32, i32
  }
  func.func @transform_6(%arg0: i32) -> (i32, i32) {
    %c0_i32 = arith.constant 0 : i32
    %c0_i32_0 = arith.constant 0 : i32
    %c0_i32_1 = arith.constant 0 : i32
    return %c0_i32, %c0_i32_0 : i32, i32
  }
  func.func @transform_7(%arg0: i32) -> (i32, i32) {
    %c0_i32 = arith.constant 0 : i32
    %c0_i32_0 = arith.constant 0 : i32
    %c0_i32_1 = arith.constant 0 : i32
    return %c0_i32, %c0_i32_0 : i32, i32
  }
  func.func @transform_8(%arg0: i32) -> (i32, i32) {
    %c0_i32 = arith.constant 0 : i32
    %c0_i32_0 = arith.constant 0 : i32
    %c0_i32_1 = arith.constant 0 : i32
    return %c0_i32, %c0_i32_0 : i32, i32
  }
  func.func @transform_9(%arg0: i32) -> (i32, i32) {
    %c0_i32 = arith.constant 0 : i32
    %c0_i32_0 = arith.constant 0 : i32
    %c0_i32_1 = arith.constant 0 : i32
    return %c0_i32, %c0_i32_0 : i32, i32
  }
  func.func @transform_10(%arg0: i32) -> (i32, i32) {
    %c0_i32 = arith.constant 0 : i32
    %c0_i32_0 = arith.constant 0 : i32
    %c0_i32_1 = arith.constant 0 : i32
    return %c0_i32, %c0_i32_0 : i32, i32
  }
  func.func @transform_11(%arg0: i32) -> (i32, i32) {
    %c0_i32 = arith.constant 0 : i32
    %c0_i32_0 = arith.constant 0 : i32
    %c0_i32_1 = arith.constant 0 : i32
    return %c0_i32, %c0_i32_0 : i32, i32
  }
  func.func @transform_12(%arg0: i32) -> i32 {
    %c0_i32 = arith.constant 0 : i32
    %c0_i32_0 = arith.constant 0 : i32
    return %c0_i32 : i32
  }
  func.func @transform_13(%arg0: i32) -> (i32, i32) {
    %c0_i32 = arith.constant 0 : i32
    %c0_i32_0 = arith.constant 0 : i32
    return %arg0, %c0_i32 : i32, i32
  }
  func.func @transform_14(%arg0: i32) -> (i32, i32) {
    %c0_i32 = arith.constant 0 : i32
    %c0_i32_0 = arith.constant 0 : i32
    return %arg0, %c0_i32 : i32, i32
  }
}

</mosaic_0001>

<bundles_post_ra>
// kernel: tpu_custom_call.1
= control target key start
LH: loop header
LB: loop body
LE: loop exit
PB: predicated region body
PF: predicated region fallthrough
CT: control target
= control target key end

     0   :  { %21 = vsyncpa [#allocation4], 0  ;;  %s2827_s0 = inlined_call_operand.hbm [shape: bf16[8,128], index: 0, kind: input, shape index: {}]   ;;  %s2828_s1 = inlined_call_operand.hbm [shape: bf16[128,256], index: 1, kind: input, shape index: {}]   ;;  %s2829_s2 = inlined_call_operand.hbm [shape: f32[1,256], index: 2, kind: input, shape index: {}]   ;;  %s2830_s3 = inlined_call_operand.hbm [shape: bf16[256,512], index: 3, kind: input, shape index: {}]   ;;  %s2831_s4 = inlined_call_operand.vmem [shape: f32[1,512], index: 4, kind: input, shape index: {}]   ;;  %s2832_s5 = inlined_call_operand.hbm [shape: bf16[512,256], index: 5, kind: input, shape index: {}]   ;;  %s2833_s6 = inlined_call_operand.vmem [shape: f32[1,256], index: 6, kind: input, shape index: {}]   ;;  %s2834_s7 = inlined_call_operand.hbm [shape: bf16[256,384], index: 7, kind: input, shape index: {}]   ;;  %s2835_s8 = inlined_call_operand.vmem [shape: f32[1,384], index: 8, kind: input, shape index: {}]   ;;  %s2836_s9 = inlined_call_operand.hbm [shape: bf16[256,128], index: 9, kind: input, shape index: {}]   ;;  %s2837_s10 = inlined_call_operand.vmem [shape: f32[1,128], index: 10, kind: input, shape index: {}]   ;;  %s2838_s11 = inlined_call_operand.vmem [shape: f32[1,128], index: 11, kind: input, shape index: {}]   ;;  %s2839_s12 = inlined_call_operand.<no memory space> [shape: f32[1], index: 12, kind: input, shape index: {}]   ;;  %s2840_s13 = inlined_call_operand.hbm [shape: bf16[8,128], index: 13, kind: output, shape index: {0}]   ;;  %s2841_s14 = inlined_call_operand.vmem [shape: f32[8,1], index: 14, kind: output, shape index: {1}]  }
   0x1   :  { %22 = vsyncpa [#allocation7], 0 }
   0x2   :  { %23 = vsyncpa [#allocation10], 0 }
   0x3   :  { %24 = vsyncpa [#allocation13], 0 }
   0x4   :  { %25 = vsyncpa [#allocation5], 0  ;;  %s2662_s29 = smov [#allocation6]  }
   0x5   :  { %s41_s30 = sshll.u32 %s2662_s29, 4  ;;  %s42_s30 = int_to_ptr.vmem [resolvable:$true] %s41_s30 }
   0x6   :  { %s2500_s15 = scalar_lea.vmem %s42_s30, 2048  ;;  %p2505_p1 = scmp.lt.s32.totalorder %s42_s30, %s42_s30 }
   0x7   :  { %p2501_p0 = scmp.ne.s32.totalorder %s42_s30, %s2500_s15  ;;  %p2506_p2 = scmp.lt.s32.totalorder %s2500_s15, %s2500_s15 }
   0x9   :  { %p2507_p3 = por %p2506_p2, %p2505_p1 }
   0xb   :  { %p2508_p4 = pnand %p2507_p3, %p2501_p0 }
   0xd   :  { %2511 = shalt.err (!%p2508_p4)
}
   0xe   :  { %s2663_s16 = smov 128   ;;  %s2664_s17 = smov 8  }
   0xf   :  { %47 = dma.hbm_to_vmem [thread:$0]  %s2828_s1, 2048, %s42_s30, [#allocation7], %s2663_s16, %s2663_s16, %s2664_s17  }
  0x10   :  { %s2665_s20 = smov [#allocation9]  }
  0x11   :  { %s63_s21 = sshll.u32 %s2665_s20, 4  ;;  %s64_s21 = int_to_ptr.vmem [resolvable:$true] %s63_s21 }
  0x12   :  { %s2520_s22 = scalar_lea.vmem %s64_s21, 8192  ;;  %p2525_p6 = scmp.lt.s32.totalorder %s64_s21, %s64_s21 }
  0x13   :  { %p2521_p5 = scmp.ne.s32.totalorder %s64_s21, %s2520_s22  ;;  %p2526_p7 = scmp.lt.s32.totalorder %s2520_s22, %s2520_s22 }
  0x15   :  { %p2527_p8 = por %p2526_p7, %p2525_p6 }
  0x17   :  { %p2528_p9 = pnand %p2527_p8, %p2521_p5 }
  0x19   :  { %2531 = shalt.err (!%p2528_p9)
}
  0x1a   :  { %s2666_s23 = smov 256   ;;  %s2667_s24 = smov 16  }
  0x1b   :  { %69 = dma.hbm_to_vmem [thread:$0]  %s2830_s3, 8192, %s64_s21, [#allocation10], %s2666_s23, %s2666_s23, %s2667_s24  }
  0x1c   :  { %s2668_s27 = smov [#allocation12]  }
  0x1d   :  { %s91_s28 = sshll.u32 %s2668_s27, 4  ;;  %s92_s28 = int_to_ptr.vmem [resolvable:$true] %s91_s28 }
  0x1e   :  { %s2540_s1 = scalar_lea.vmem %s92_s28, 6144  ;;  %p2545_p11 = scmp.lt.s32.totalorder %s92_s28, %s92_s28 }
  0x1f   :  { %p2541_p10 = scmp.ne.s32.totalorder %s92_s28, %s2540_s1  ;;  %p2546_p12 = scmp.lt.s32.totalorder %s2540_s1, %s2540_s1 }
  0x21   :  { %p2547_p13 = por %p2546_p12, %p2545_p11 }
  0x23   :  { %p2548_p0 = pnand %p2547_p13, %p2541_p10 }
  0x25   :  { %2551 = shalt.err (!%p2548_p0)
}
  0x26   :  { %s2669_s29 = smov 192   ;;  %s2670_s30 = smov 12  }
  0x27   :  { %97 = dma.hbm_to_vmem [thread:$0]  %s2834_s7, 6144, %s92_s28, [#allocation13], %s2669_s29, %s2669_s29, %s2670_s30  }
  0x28   :  { %s2671_s19 = smov [#allocation3]   ;;  %s2672_s3 = smov [#allocation8]  }
  0x29   :  { %s32_s20 = sshll.u32 %s2671_s19, 4  ;;  %s54_s21 = sshll.u32 %s2672_s3, 4  ;;  %s33_s20 = int_to_ptr.vmem [resolvable:$true] %s32_s20  ;;  %s55_s21 = int_to_ptr.vmem [resolvable:$true] %s54_s21 }
  0x2a   :  { %s2560_s22 = scalar_lea.vmem %s33_s20, 64  ;;  %p2565_p2 = scmp.lt.s32.totalorder %s33_s20, %s33_s20 }
  0x2b   :  { %p2561_p1 = scmp.ne.s32.totalorder %s33_s20, %s2560_s22  ;;  %p2566_p3 = scmp.lt.s32.totalorder %s2560_s22, %s2560_s22 }
  0x2d   :  { %p2567_p4 = por %p2566_p3, %p2565_p2 }
  0x2f   :  { %p2568_p5 = pnand %p2567_p4, %p2561_p1 }
  0x31   :  { %2571 = shalt.err (!%p2568_p5)
}
  0x32   :  { %35 = dma.hbm_to_vmem [thread:$0]  %s2827_s0, 64, %s33_s20, [#allocation4]  }
  0x33   :  { %s2580_s25 = scalar_lea.vmem %s55_s21, 32  ;;  %p2585_p7 = scmp.lt.s32.totalorder %s55_s21, %s55_s21 }
  0x34   :  { %p2581_p6 = scmp.ne.s32.totalorder %s55_s21, %s2580_s25  ;;  %p2586_p8 = scmp.lt.s32.totalorder %s2580_s25, %s2580_s25 }
  0x36   :  { %p2587_p9 = por %p2586_p8, %p2585_p7 }
  0x38   :  { %p2588_p10 = pnand %p2587_p9, %p2581_p6 }
  0x3a   :  { %2591 = shalt.err (!%p2588_p10)
}
  0x3b   :  { %57 = dma.hbm_to_vmem [thread:$0]  %s2829_s2, 32, %s55_s21, [#allocation7]  }
  0x3c   :  { %s2673_s27 = smov [#allocation11]   ;;  %s2674_s1 = smov [#allocation14]  }
  0x3d   :  { %s77_s28 = sshll.u32 %s2673_s27, 4  ;;  %s105_s29 = sshll.u32 %s2674_s1, 4  ;;  %s78_s28 = int_to_ptr.vmem [resolvable:$true] %s77_s28  ;;  %s106_s29 = int_to_ptr.vmem [resolvable:$true] %s105_s29 }
  0x3e   :  { %s2600_s30 = scalar_lea.vmem %s78_s28, 8192  ;;  %p2605_p12 = scmp.lt.s32.totalorder %s78_s28, %s78_s28 }
  0x3f   :  { %p2601_p11 = scmp.ne.s32.totalorder %s78_s28, %s2600_s30  ;;  %p2606_p13 = scmp.lt.s32.totalorder %s2600_s30, %s2600_s30 }
  0x41   :  { %p2607_p0 = por %p2606_p13, %p2605_p12 }
  0x43   :  { %p2608_p1 = pnand %p2607_p0, %p2601_p11 }
  0x45   :  { %2611 = shalt.err (!%p2608_p1)
}
  0x46   :  { %83 = dma.hbm_to_vmem [thread:$0]  %s2832_s5, 8192, %s78_s28, [#allocation10], %s2663_s16, %s2663_s16, %s2664_s17  }
  0x47   :  { %s2620_s2 = scalar_lea.vmem %s106_s29, 2048  ;;  %p2625_p3 = scmp.lt.s32.totalorder %s106_s29, %s106_s29 }
  0x48   :  { %p2621_p2 = scmp.ne.s32.totalorder %s106_s29, %s2620_s2  ;;  %p2626_p4 = scmp.lt.s32.totalorder %s2620_s2, %s2620_s2 }
  0x4a   :  { %p2627_p5 = por %p2626_p4, %p2625_p3 }
  0x4c   :  { %p2628_p6 = pnand %p2627_p5, %p2621_p2 }
  0x4e   :  { %2631 = shalt.err (!%p2628_p6)
}
  0x4f   :  { %s2675_s18 = smov 64   ;;  %s2676_s19 = smov 4  }
  0x50   :  { %111 = dma.hbm_to_vmem [thread:$0]  %s2836_s9, 2048, %s106_s29, [#allocation13], %s2675_s18, %s2675_s18, %s2676_s19  }
  0x51   :  { %2652 = dma.done.wait [#allocation4], 64  }
  0x52   :  { %2653 = vsyncadd [#allocation4], 4294967232 }
  0x53   :  { %2654 = dma.done.wait [#allocation7], 2080  }
  0x54   :  { %2655 = vsyncadd [#allocation7], 4294965216 }
  0x55   :  { %2656 = dma.done.wait [#allocation10], 16384  }
  0x56   :  { %2657 = vsyncadd [#allocation10], 4294950912 }
  0x57   :  { %2658 = dma.done.wait [#allocation13], 8192  }
  0x58   :  { %2659 = vsyncadd [#allocation13], 4294959104  ;;  %v2677_v0 = vmov 0   ;;  %v2190_v1 = vld [vmem:[#allocation6 + $0x74] ss:$8 sps:$4 sm:$0xff]   ;;  %vm1895_vm0 = vcmask 7168  }
  0x59   :  { %511 = vmatprep.mubr.bf16.mxu0 %v2677_v0  ;;  %v2192_v2 = vld [vmem:[#allocation6 + $0x70] ss:$8 sps:$4 sm:$0xff]   ;;  %479 = vmatprep.subr.bf16.mxu0 %v2190_v1  ;;  %v2193_v3 = vld [vmem:[#allocation6 + $0x64] ss:$8 sps:$4 sm:$0xff]   ;;  %v2195_v4 = vld [vmem:[#allocation6 + $0x60] ss:$8 sps:$4 sm:$0xff]  }
  0x5a   :  { %480 = vmatpush1.bf16.msra.mxu0 %v2192_v2  ;;  %v2196_v5 = vld [vmem:[#allocation6 + $0x54] ss:$8 sps:$4 sm:$0xff]   ;;  %v2198_v6 = vld [vmem:[#allocation6 + $0x50] ss:$8 sps:$4 sm:$0xff]   ;;  %v2199_v7 = vld [vmem:[#allocation6 + $0x44] ss:$8 sps:$4 sm:$0xff]  }
  0x5b   :  { %481 = vmatprep.subr.bf16.mxu0 %v2193_v3  ;;  %v2201_v8 = vld [vmem:[#allocation6 + $0x40] ss:$8 sps:$4 sm:$0xff]   ;;  %v2202_v10 = vld [vmem:[#allocation6 + $0x34] ss:$8 sps:$4 sm:$0xff]   ;;  %v2204_v13 = vld [vmem:[#allocation6 + $0x30] ss:$8 sps:$4 sm:$0xff]  }
  0x5c   :  { %v2214_v9 = vld [vmem:[#allocation9 + $0xe4] ss:$16 sps:$4 sm:$0xff]   ;;  %v2219_v11 = vld [vmem:[#allocation9 + $0xe0] ss:$16 sps:$4 sm:$0xff]   ;;  %v2218_v26 = vld [vmem:[#allocation9 + $0xec] ss:$16 sps:$4 sm:$0xff]  }
  0x5d   :  { %865 = vmatprep.subr.bf16.mxu1 %v2214_v9  ;;  %v2220_v12 = vld [vmem:[#allocation9 + $0xc4] ss:$16 sps:$4 sm:$0xff]   ;;  %v2225_v15 = vld [vmem:[#allocation9 + $0xc0] ss:$16 sps:$4 sm:$0xff]   ;;  %v387_v29 = vld [vmem:[#allocation3] sm:$0xf] }
  0x5e   :  { %482 = vmatpush1.bf16.msra.mxu0 %v2195_v4  ;;  %v2205_v14 = vld [vmem:[#allocation6 + $0x24] ss:$8 sps:$4 sm:$0xff]   ;;  %866 = vmatpush1.bf16.msra.mxu1 %v2219_v11  ;;  %v2207_v17 = vld [vmem:[#allocation6 + $0x20] ss:$8 sps:$4 sm:$0xff]   ;;  %v2208_v18 = vld [vmem:[#allocation6 + $0x14] ss:$8 sps:$4 sm:$0xff]  }
  0x5f   :  { %483 = vmatprep.subr.bf16.mxu0 %v2196_v5  ;;  %867 = vmatprep.subr.bf16.mxu1 %v2220_v12  ;;  %v2226_v16 = vld [vmem:[#allocation9 + $0xa4] ss:$16 sps:$4 sm:$0xff]   ;;  %v2231_v19 = vld [vmem:[#allocation9 + $0xa0] ss:$16 sps:$4 sm:$0xff]   ;;  %v2216_v30 = vld [vmem:[#allocation9 + $0xe8] ss:$16 sps:$4 sm:$0xff]  }
  0x60   :  { %v2232_v20 = vld [vmem:[#allocation9 + $0x84] ss:$16 sps:$4 sm:$0xff]   ;;  %v2237_v23 = vld [vmem:[#allocation9 + $0x80] ss:$16 sps:$4 sm:$0xff]   ;;  %v2224_v31 = vld [vmem:[#allocation9 + $0xcc] ss:$16 sps:$4 sm:$0xff]  }
  0x61   :  { %v2210_v21 = vld [vmem:[#allocation6 + $0x10] ss:$8 sps:$4 sm:$0xff]   ;;  %v2211_v22 = vld [vmem:[#allocation6 + $0x4] ss:$8 sps:$4 sm:$0xff]   ;;  %v2213_v25 = vld [vmem:[#allocation6] ss:$8 sps:$4 sm:$0xff]  }
  0x62   :  { %484 = vmatpush1.bf16.msra.mxu0 %v2198_v6  ;;  %868 = vmatpush1.bf16.msra.mxu1 %v2225_v15  ;;  %v2238_v24 = vld [vmem:[#allocation9 + $0x64] ss:$16 sps:$4 sm:$0xff]   ;;  %v2243_v27 = vld [vmem:[#allocation9 + $0x60] ss:$16 sps:$4 sm:$0xff]   ;;  %v2222_v34 = vld [vmem:[#allocation9 + $0xc8] ss:$16 sps:$4 sm:$0xff]  }
  0x63   :  { %485 = vmatprep.subr.bf16.mxu0 %v2199_v7  ;;  %869 = vmatprep.subr.bf16.mxu1 %v2226_v16  ;;  %v2244_v28 = vld [vmem:[#allocation9 + $0x44] ss:$16 sps:$4 sm:$0xff]   ;;  %v2249_v32 = vld [vmem:[#allocation9 + $0x40] ss:$16 sps:$4 sm:$0xff]   ;;  %v2230_v35 = vld [vmem:[#allocation9 + $0xac] ss:$16 sps:$4 sm:$0xff]  }
  0x64   :  { %v2250_v33 = vld [vmem:[#allocation9 + $0x24] ss:$16 sps:$4 sm:$0xff]   ;;  %v2255_v36 = vld [vmem:[#allocation9 + $0x20] ss:$16 sps:$4 sm:$0xff]   ;;  %v2228_v38 = vld [vmem:[#allocation9 + $0xa8] ss:$16 sps:$4 sm:$0xff]  }
  0x65   :  { %v2256_v37 = vld [vmem:[#allocation9 + $0x4] ss:$16 sps:$4 sm:$0xff]   ;;  %v2236_v39 = vld [vmem:[#allocation9 + $0x8c] ss:$16 sps:$4 sm:$0xff]   ;;  %v2261_v40 = vld [vmem:[#allocation9] ss:$16 sps:$4 sm:$0xff]  }
  0x66   :  { %486 = vmatpush1.bf16.msra.mxu0 %v2201_v8  ;;  %870 = vmatpush1.bf16.msra.mxu1 %v2231_v19  ;;  %v2262_v41 = vld [vmem:[#allocation9 + $0x1e4] ss:$16 sps:$4 sm:$0xff]   ;;  %v2234_v42 = vld [vmem:[#allocation9 + $0x88] ss:$16 sps:$4 sm:$0xff]   ;;  %v2242_v43 = vld [vmem:[#allocation9 + $0x6c] ss:$16 sps:$4 sm:$0xff]  }
  0x67   :  { %487 = vmatprep.subr.bf16.mxu0 %v2202_v10  ;;  %871 = vmatprep.subr.bf16.mxu1 %v2232_v20  ;;  %v2267_v44 = vld [vmem:[#allocation9 + $0x1e0] ss:$16 sps:$4 sm:$0xff]   ;;  %v2268_v45 = vld [vmem:[#allocation9 + $0x1c4] ss:$16 sps:$4 sm:$0xff]   ;;  %v2240_v46 = vld [vmem:[#allocation9 + $0x68] ss:$16 sps:$4 sm:$0xff]   ;;  %v389_v20 = vlaneseq }
  0x68   :  { %v2273_v47 = vld [vmem:[#allocation9 + $0x1c0] ss:$16 sps:$4 sm:$0xff]   ;;  %v2248_v48 = vld [vmem:[#allocation9 + $0x4c] ss:$16 sps:$4 sm:$0xff]   ;;  %v2274_v49 = vld [vmem:[#allocation9 + $0x1a4] ss:$16 sps:$4 sm:$0xff]  }
  0x69   :  { %v2246_v50 = vld [vmem:[#allocation9 + $0x48] ss:$16 sps:$4 sm:$0xff]   ;;  %v2279_v51 = vld [vmem:[#allocation9 + $0x1a0] ss:$16 sps:$4 sm:$0xff]   ;;  %v2254_v52 = vld [vmem:[#allocation9 + $0x2c] ss:$16 sps:$4 sm:$0xff]  }
  0x6a   :  { %488 = vmatpush1.bf16.msra.mxu0 %v2204_v13  ;;  %872 = vmatpush1.bf16.msra.mxu1 %v2237_v23  ;;  %v2280_v53 = vld [vmem:[#allocation9 + $0x184] ss:$16 sps:$4 sm:$0xff]   ;;  %v2252_v54 = vld [vmem:[#allocation9 + $0x28] ss:$16 sps:$4 sm:$0xff]   ;;  %v2285_v55 = vld [vmem:[#allocation9 + $0x180] ss:$16 sps:$4 sm:$0xff]  }
  0x6b   :  { %489 = vmatprep.subr.bf16.mxu0 %v2205_v14  ;;  %873 = vmatprep.subr.bf16.mxu1 %v2238_v24  ;;  %v2260_v56 = vld [vmem:[#allocation9 + $0xc] ss:$16 sps:$4 sm:$0xff]   ;;  %v2286_v57 = vld [vmem:[#allocation9 + $0x164] ss:$16 sps:$4 sm:$0xff]   ;;  %v2258_v58 = vld [vmem:[#allocation9 + $0x8] ss:$16 sps:$4 sm:$0xff]  }
  0x6c   :  { %v2291_v59 = vld [vmem:[#allocation9 + $0x160] ss:$16 sps:$4 sm:$0xff]   ;;  %v2266_v60 = vld [vmem:[#allocation9 + $0x1ec] ss:$16 sps:$4 sm:$0xff]   ;;  %v2292_v61 = vld [vmem:[#allocation9 + $0x144] ss:$16 sps:$4 sm:$0xff]  }
  0x6d   :  { %v2264_v62 = vld [vmem:[#allocation9 + $0x1e8] ss:$16 sps:$4 sm:$0xff]   ;;  %v2297_v63 = vld [vmem:[#allocation9 + $0x140] ss:$16 sps:$4 sm:$0xff]   ;;  %v2272_v0 = vld [vmem:[#allocation9 + $0x1cc] ss:$16 sps:$4 sm:$0xff]  }
  0x6e   :  { %490 = vmatpush1.bf16.msra.mxu0 %v2207_v17  ;;  %874 = vmatpush1.bf16.msra.mxu1 %v2243_v27  ;;  %v2270_v1 = vld [vmem:[#allocation9 + $0x1c8] ss:$16 sps:$4 sm:$0xff]   ;;  %v2278_v2 = vld [vmem:[#allocation9 + $0x1ac] ss:$16 sps:$4 sm:$0xff]   ;;  %v2298_v10 = vld [vmem:[#allocation9 + $0x124] ss:$16 sps:$4 sm:$0xff]  }
  0x6f   :  { %491 = vmatprep.subr.bf16.mxu0 %v2208_v18  ;;  %875 = vmatprep.subr.bf16.mxu1 %v2244_v28  ;;  %v2276_v3 = vld [vmem:[#allocation9 + $0x1a8] ss:$16 sps:$4 sm:$0xff]   ;;  %v2284_v4 = vld [vmem:[#allocation9 + $0x18c] ss:$16 sps:$4 sm:$0xff]   ;;  %v2303_v13 = vld [vmem:[#allocation9 + $0x120] ss:$16 sps:$4 sm:$0xff]  }
  0x70   :  { %v2282_v5 = vld [vmem:[#allocation9 + $0x188] ss:$16 sps:$4 sm:$0xff]   ;;  %v2290_v6 = vld [vmem:[#allocation9 + $0x16c] ss:$16 sps:$4 sm:$0xff]   ;;  %v2304_v14 = vld [vmem:[#allocation9 + $0x104] ss:$16 sps:$4 sm:$0xff]  }
  0x71   :  { %v2288_v7 = vld [vmem:[#allocation9 + $0x168] ss:$16 sps:$4 sm:$0xff]   ;;  %v2296_v8 = vld [vmem:[#allocation9 + $0x14c] ss:$16 sps:$4 sm:$0xff]   ;;  %v2309_v17 = vld [vmem:[#allocation9 + $0x100] ss:$16 sps:$4 sm:$0xff]  }
  0x72   :  { %492 = vmatpush1.bf16.msra.mxu0 %v2210_v21  ;;  %876 = vmatpush1.bf16.msra.mxu1 %v2249_v32  ;;  %v2294_v9 = vld [vmem:[#allocation9 + $0x148] ss:$16 sps:$4 sm:$0xff]   ;;  %v2302_v11 = vld [vmem:[#allocation9 + $0x12c] ss:$16 sps:$4 sm:$0xff]   ;;  %v2781_v21 = vshrl.u32 %v389_v20, 7 }
  0x73   :  { %493 = vmatprep.subr.bf16.mxu0 %v2211_v22  ;;  %877 = vmatprep.subr.bf16.mxu1 %v2250_v33  ;;  %v2300_v12 = vld [vmem:[#allocation9 + $0x128] ss:$16 sps:$4 sm:$0xff]   ;;  %v2308_v15 = vld [vmem:[#allocation9 + $0x10c] ss:$16 sps:$4 sm:$0xff]  }
  0x74   :  { %v2306_v16 = vld [vmem:[#allocation9 + $0x108] ss:$16 sps:$4 sm:$0xff]   ;;  %v2312_v18 = vld [vmem:[#allocation11 + $0x74] ss:$8 sps:$4 sm:$0xff]   ;;  %v2784_v22 = vsub.s32 0, %v2781_v21  ;;  %v2787_v24 = vsub.s32 1, %v2781_v21 }
  0x75   :  { %v2315_v19 = vld [vmem:[#allocation11 + $0x174] ss:$8 sps:$4 sm:$0xff]  }
  0x76   :  { %494 = vmatpush1.bf16.msra.mxu0 %v2213_v25  ;;  %878 = vmatpush1.bf16.msra.mxu1 %v2255_v36  ;;  %v156_v23 = vld [vmem:[#allocation8] sm:$0x3]  ;;  %v2310_v36 = vld [vmem:[#allocation11 + $0x70] ss:$8 sps:$4 sm:$0xff]  }
  0x77   :  { %906 = vmatprep.subr.bf16.mxu0 %v2218_v26  ;;  %879 = vmatprep.subr.bf16.mxu1 %v2256_v37  ;;  %v392_v25 = vrot.slane %v156_v23, %v2784_v22  ;;  %v396_v26 = vrot.slane %v156_v23, %v2787_v24  ;;  %v2313_v37 = vld [vmem:[#allocation11 + $0x170] ss:$8 sps:$4 sm:$0xff]   ;;  %v2387_v20 = vld [vmem:[#allocation11 + $0x1b4] ss:$8 sps:$4 sm:$0xff]  }
  0x78   :  { %v2382_v23 = vld [vmem:[#allocation11 + $0xb0] ss:$8 sps:$4 sm:$0xff]  }
  0x79   :  { %512 = vmatmul.mubr.bf16.vlgmr.msra.gmra.mxu0 %v387_v29 }
  0x7a   :  { %907 = vmatpush1.bf16.msra.mxu0 %v2216_v30  ;;  %880 = vmatpush1.bf16.msra.mxu1 %v2261_v40  ;;  %v2321_v40 = vld [vmem:[#allocation11 + $0x164] ss:$8 sps:$4 sm:$0xff]  }
  0x7b   :  { %908 = vmatprep.subr.bf16.mxu0 %v2224_v31  ;;  %881 = vmatprep.subr.bf16.mxu1 %v2262_v41  ;;  %v2316_v41 = vld [vmem:[#allocation11 + $0x60] ss:$8 sps:$4 sm:$0xff]  }
  0x7e   :  { %909 = vmatpush1.bf16.msra.mxu0 %v2222_v34  ;;  %882 = vmatpush2.bf16.msra.mxu1 %v2267_v44  ;;  %v2327_v44 = vld [vmem:[#allocation11 + $0x154] ss:$8 sps:$4 sm:$0xff]  }
  0x7f   :  { %910 = vmatprep.subr.bf16.mxu0 %v2230_v35  ;;  %883 = vmatprep.subr.bf16.mxu1 %v2268_v45  ;;  %v2322_v45 = vld [vmem:[#allocation11 + $0x50] ss:$8 sps:$4 sm:$0xff]  }
  0x82   :  { %911 = vmatpush1.bf16.msra.mxu0 %v2228_v38  ;;  %884 = vmatpush2.bf16.msra.mxu1 %v2273_v47  ;;  %v2330_v47 = vld [vmem:[#allocation11 + $0x44] ss:$8 sps:$4 sm:$0xff]  }
  0x83   :  { %912 = vmatprep.subr.bf16.mxu0 %v2236_v39  ;;  %885 = vmatprep.subr.bf16.mxu1 %v2274_v49  ;;  %v2318_v39 = vld [vmem:[#allocation11 + $0x64] ss:$8 sps:$4 sm:$0xff]   ;;  %v2328_v49 = vld [vmem:[#allocation11 + $0x40] ss:$8 sps:$4 sm:$0xff]  }
  0x86   :  { %913 = vmatpush1.bf16.msra.mxu0 %v2234_v42  ;;  %886 = vmatpush2.bf16.msra.mxu1 %v2279_v51  ;;  %v2319_v42 = vld [vmem:[#allocation11 + $0x160] ss:$8 sps:$4 sm:$0xff]   ;;  %v2336_v51 = vld [vmem:[#allocation11 + $0x34] ss:$8 sps:$4 sm:$0xff]  }
  0x87   :  { %914 = vmatprep.subr.bf16.mxu0 %v2242_v43  ;;  %887 = vmatprep.subr.bf16.mxu1 %v2280_v53  ;;  %v2324_v43 = vld [vmem:[#allocation11 + $0x54] ss:$8 sps:$4 sm:$0xff]   ;;  %v2334_v53 = vld [vmem:[#allocation11 + $0x30] ss:$8 sps:$4 sm:$0xff]  }
  0x8a   :  { %915 = vmatpush1.bf16.msra.mxu0 %v2240_v46  ;;  %888 = vmatpush2.bf16.msra.mxu1 %v2285_v55  ;;  %v2325_v46 = vld [vmem:[#allocation11 + $0x150] ss:$8 sps:$4 sm:$0xff]   ;;  %v2342_v55 = vld [vmem:[#allocation11 + $0x24] ss:$8 sps:$4 sm:$0xff]  }
  0x8b   :  { %916 = vmatprep.subr.bf16.mxu0 %v2248_v48  ;;  %889 = vmatprep.subr.bf16.mxu1 %v2286_v57  ;;  %v2333_v48 = vld [vmem:[#allocation11 + $0x144] ss:$8 sps:$4 sm:$0xff]   ;;  %v2340_v57 = vld [vmem:[#allocation11 + $0x20] ss:$8 sps:$4 sm:$0xff]  }
  0x8e   :  { %917 = vmatpush1.bf16.msra.mxu0 %v2246_v50  ;;  %890 = vmatpush2.bf16.msra.mxu1 %v2291_v59  ;;  %v2331_v50 = vld [vmem:[#allocation11 + $0x140] ss:$8 sps:$4 sm:$0xff]   ;;  %v2348_v59 = vld [vmem:[#allocation11 + $0x14] ss:$8 sps:$4 sm:$0xff]  }
  0x8f   :  { %918 = vmatprep.subr.bf16.mxu0 %v2254_v52  ;;  %891 = vmatprep.subr.bf16.mxu1 %v2292_v61  ;;  %v2339_v52 = vld [vmem:[#allocation11 + $0x134] ss:$8 sps:$4 sm:$0xff]   ;;  %v2346_v61 = vld [vmem:[#allocation11 + $0x10] ss:$8 sps:$4 sm:$0xff]  }
  0x92   :  { %919 = vmatpush1.bf16.msra.mxu0 %v2252_v54  ;;  %892 = vmatpush2.bf16.msra.mxu1 %v2297_v63  ;;  %v2337_v54 = vld [vmem:[#allocation11 + $0x130] ss:$8 sps:$4 sm:$0xff]   ;;  %v2354_v63 = vld [vmem:[#allocation11 + $0x4] ss:$8 sps:$4 sm:$0xff]  }
  0x93   :  { %920 = vmatprep.subr.bf16.mxu0 %v2260_v56  ;;  %893 = vmatprep.subr.bf16.mxu1 %v2298_v10  ;;  %v2345_v56 = vld [vmem:[#allocation11 + $0x124] ss:$8 sps:$4 sm:$0xff]   ;;  %v2367_v10 = vld [vmem:[#allocation11 + $0x1e0] ss:$8 sps:$4 sm:$0xff]  }
  0x96   :  { %921 = vmatpush1.bf16.msra.mxu0 %v2258_v58  ;;  %894 = vmatpush2.bf16.msra.mxu1 %v2303_v13  ;;  %v2343_v58 = vld [vmem:[#allocation11 + $0x120] ss:$8 sps:$4 sm:$0xff]   ;;  %v2370_v13 = vld [vmem:[#allocation11 + $0xd0] ss:$8 sps:$4 sm:$0xff]  }
  0x97   :  { %922 = vmatprep.subr.bf16.mxu0 %v2266_v60  ;;  %895 = vmatprep.subr.bf16.mxu1 %v2304_v14  ;;  %v2351_v60 = vld [vmem:[#allocation11 + $0x114] ss:$8 sps:$4 sm:$0xff]   ;;  %v2373_v14 = vld [vmem:[#allocation11 + $0x1d0] ss:$8 sps:$4 sm:$0xff]  }
  0x9a   :  { %923 = vmatpush2.bf16.msra.mxu0 %v2264_v62  ;;  %896 = vmatpush2.bf16.msra.mxu1 %v2309_v17  ;;  %v2349_v62 = vld [vmem:[#allocation11 + $0x110] ss:$8 sps:$4 sm:$0xff]   ;;  %v2376_v17 = vld [vmem:[#allocation11 + $0xc0] ss:$8 sps:$4 sm:$0xff]  }
  0x9b   :  { %924 = vmatprep.subr.bf16.mxu0 %v2272_v0  ;;  %1286 = vmatprep.subr.bf16.mxu1 %v2312_v18  ;;  %v2357_v0 = vld [vmem:[#allocation11 + $0x104] ss:$8 sps:$4 sm:$0xff]   ;;  %v2379_v18 = vld [vmem:[#allocation11 + $0x1c0] ss:$8 sps:$4 sm:$0xff]  }
  0x9e   :  { %925 = vmatpush2.bf16.msra.mxu0 %v2270_v1  ;;  %v2352_v1 = vld [vmem:[#allocation11] ss:$8 sps:$4 sm:$0xff]  }
  0x9f   :  { %926 = vmatprep.subr.bf16.mxu0 %v2278_v2  ;;  %v2355_v2 = vld [vmem:[#allocation11 + $0x100] ss:$8 sps:$4 sm:$0xff]  }
  0xa2   :  { %927 = vmatpush2.bf16.msra.mxu0 %v2276_v3  ;;  %v2360_v3 = vld [vmem:[#allocation11 + $0xf4] ss:$8 sps:$4 sm:$0xff]  }
  0xa3   :  { %928 = vmatprep.subr.bf16.mxu0 %v2284_v4  ;;  %v2363_v4 = vld [vmem:[#allocation11 + $0x1f4] ss:$8 sps:$4 sm:$0xff]  }
  0xa6   :  { %929 = vmatpush2.bf16.msra.mxu0 %v2282_v5  ;;  %v2358_v5 = vld [vmem:[#allocation11 + $0xf0] ss:$8 sps:$4 sm:$0xff]  }
  0xa7   :  { %930 = vmatprep.subr.bf16.mxu0 %v2290_v6  ;;  %v2361_v6 = vld [vmem:[#allocation11 + $0x1f0] ss:$8 sps:$4 sm:$0xff]  }
  0xaa   :  { %931 = vmatpush2.bf16.msra.mxu0 %v2288_v7  ;;  %v2366_v7 = vld [vmem:[#allocation11 + $0xe4] ss:$8 sps:$4 sm:$0xff]  }
  0xab   :  { %932 = vmatprep.subr.bf16.mxu0 %v2296_v8  ;;  %v2369_v8 = vld [vmem:[#allocation11 + $0x1e4] ss:$8 sps:$4 sm:$0xff]  }
  0xae   :  { %933 = vmatpush2.bf16.msra.mxu0 %v2294_v9  ;;  %v2364_v9 = vld [vmem:[#allocation11 + $0xe0] ss:$8 sps:$4 sm:$0xff]  }
  0xaf   :  { %934 = vmatprep.subr.bf16.mxu0 %v2302_v11  ;;  %v2372_v11 = vld [vmem:[#allocation11 + $0xd4] ss:$8 sps:$4 sm:$0xff]  }
  0xb2   :  { %935 = vmatpush2.bf16.msra.mxu0 %v2300_v12  ;;  %v2375_v12 = vld [vmem:[#allocation11 + $0x1d4] ss:$8 sps:$4 sm:$0xff]  }
  0xb3   :  { %936 = vmatprep.subr.bf16.mxu0 %v2308_v15  ;;  %v2378_v15 = vld [vmem:[#allocation11 + $0xc4] ss:$8 sps:$4 sm:$0xff]  }
  0xb6   :  { %937 = vmatpush2.bf16.msra.mxu0 %v2306_v16  ;;  %v2381_v16 = vld [vmem:[#allocation11 + $0x1c4] ss:$8 sps:$4 sm:$0xff]  }
  0xb7   :  { %1327 = vmatprep.subr.bf16.mxu0 %v2315_v19  ;;  %v2384_v19 = vld [vmem:[#allocation11 + $0xb4] ss:$8 sps:$4 sm:$0xff]  }
 0x139   :  { %v513_v27 = vpop.f32.mrf.mxu0 }
 0x13a   :  { %v514_v28 = vadd.f32 %v513_v27, %v392_v25  ;;  %v2385_v25 = vld [vmem:[#allocation11 + $0x1b0] ss:$8 sps:$4 sm:$0xff]   ;;  %v2393_v27 = vld [vmem:[#allocation11 + $0x1a4] ss:$8 sps:$4 sm:$0xff]  }
 0x13b   :  { %v515_v29 = vpop.f32.mrf.mxu0 }
 0x13c   :  { %v516_v30 = vadd.f32 %v515_v29, %v396_v26  ;;  %v520_v31 = vmax.f32 %v514_v28, 0.0  ;;  %v2390_v26 = vld [vmem:[#allocation11 + $0xa4] ss:$8 sps:$4 sm:$0xff]   ;;  %v2388_v28 = vld [vmem:[#allocation11 + $0xa0] ss:$8 sps:$4 sm:$0xff]  }
 0x13d   :  { %v517_v32 = vpop.f32.mrf.mxu0  ;;  %v2391_v29 = vld [vmem:[#allocation11 + $0x1a0] ss:$8 sps:$4 sm:$0xff]  }
 0x13e   :  { %v521_v33 = vmax.f32 %v516_v30, 0.0  ;;  %v522_v38 = vpack.c.bf16 %v520_v31, %v520_v31  ;;  %v2396_v30 = vld [vmem:[#allocation11 + $0x94] ss:$8 sps:$4 sm:$0xff]   ;;  %v2394_v32 = vld [vmem:[#allocation11 + $0x90] ss:$8 sps:$4 sm:$0xff]  }
 0x13f   :  { %v518_v34 = vpop.f32.mrf.mxu0  ;;  %v2399_v31 = vld [vmem:[#allocation11 + $0x194] ss:$8 sps:$4 sm:$0xff]  }
 0x140   :  { %v523_v35 = vpack.c.bf16 %v521_v33, %v521_v33  ;;  %v2397_v33 = vld [vmem:[#allocation11 + $0x190] ss:$8 sps:$4 sm:$0xff]   ;;  %v2402_v34 = vld [vmem:[#allocation11 + $0x84] ss:$8 sps:$4 sm:$0xff]  }
 0x142   :  { %897 = vmatprep.mubr.bf16.mxu1 %v523_v35  ;;  %938 = vmatprep.mubr.bf16.mxu0 %v523_v35  ;;  %v2405_v35 = vld [vmem:[#allocation11 + $0x184] ss:$8 sps:$4 sm:$0xff]  }
 0x143   :  { %898 = vmatmul.mubr.bf16.vlgmr.msra.gmra.mxu1 %v522_v38  ;;  %939 = vmatmul.mubr.bf16.vlgmr.msra.gmra.mxu0 %v522_v38  ;;  %v2408_v38 = vld [vmem:[#allocation12 + $0xac] ss:$12 sps:$4 sm:$0xff]  }
 0x144   :  { %1287 = vmatpush1.bf16.msra.mxu1 %v2310_v36  ;;  %1328 = vmatpush1.bf16.msra.mxu0 %v2313_v37  ;;  %v2400_v36 = vld [vmem:[#allocation11 + $0x80] ss:$8 sps:$4 sm:$0xff]  }
 0x145   :  { %1288 = vmatprep.subr.bf16.mxu1 %v2318_v39  ;;  %1329 = vmatprep.subr.bf16.mxu0 %v2321_v40  ;;  %v2403_v37 = vld [vmem:[#allocation11 + $0x180] ss:$8 sps:$4 sm:$0xff]   ;;  %v2433_v39 = vld [vmem:[#allocation12 + $0x170] ss:$12 sps:$4 sm:$0xff]   ;;  %v535_v40 = vsub.s32 2, %v2781_v21 }
 0x148   :  { %1289 = vmatpush1.bf16.msra.mxu1 %v2316_v41  ;;  %1330 = vmatpush1.bf16.msra.mxu0 %v2319_v42  ;;  %v221_v41 = vld [vmem:[%s2831_s4] sm:$0xf]  ;;  %v539_v42 = vsub.s32 3, %v2781_v21 }
 0x149   :  { %1290 = vmatprep.subr.bf16.mxu1 %v2324_v43  ;;  %1331 = vmatprep.subr.bf16.mxu0 %v2327_v44  ;;  %v528_v43 = vrot.slane %v221_v41, %v2784_v22  ;;  %v536_v44 = vrot.slane %v221_v41, %v535_v40 }
 0x14c   :  { %1291 = vmatpush1.bf16.msra.mxu1 %v2322_v45  ;;  %1332 = vmatpush1.bf16.msra.mxu0 %v2325_v46  ;;  %v532_v45 = vrot.slane %v221_v41, %v2787_v24  ;;  %v540_v46 = vrot.slane %v221_v41, %v539_v42  ;;  %v2457_v41 = vld [vmem:[#allocation12 + $0xf4] ss:$12 sps:$4 sm:$0xff]   ;;  %v2458_v42 = vld [vmem:[#allocation12 + $0xf8] ss:$12 sps:$4 sm:$0xff]  }
 0x14d   :  { %1292 = vmatprep.subr.bf16.mxu1 %v2330_v47  ;;  %1333 = vmatprep.subr.bf16.mxu0 %v2333_v48 }
 0x150   :  { %1293 = vmatpush1.bf16.msra.mxu1 %v2328_v49  ;;  %1334 = vmatpush1.bf16.msra.mxu0 %v2331_v50 }
 0x151   :  { %1294 = vmatprep.subr.bf16.mxu1 %v2336_v51  ;;  %1335 = vmatprep.subr.bf16.mxu0 %v2339_v52 }
 0x154   :  { %1295 = vmatpush1.bf16.msra.mxu1 %v2334_v53  ;;  %1336 = vmatpush1.bf16.msra.mxu0 %v2337_v54 }
 0x155   :  { %1296 = vmatprep.subr.bf16.mxu1 %v2342_v55  ;;  %1337 = vmatprep.subr.bf16.mxu0 %v2345_v56 }
 0x158   :  { %1297 = vmatpush1.bf16.msra.mxu1 %v2340_v57  ;;  %1338 = vmatpush1.bf16.msra.mxu0 %v2343_v58 }
 0x159   :  { %1298 = vmatprep.subr.bf16.mxu1 %v2348_v59  ;;  %1339 = vmatprep.subr.bf16.mxu0 %v2351_v60 }
 0x15c   :  { %1299 = vmatpush1.bf16.msra.mxu1 %v2346_v61  ;;  %1340 = vmatpush1.bf16.msra.mxu0 %v2349_v62 }
 0x15d   :  { %1300 = vmatprep.subr.bf16.mxu1 %v2354_v63  ;;  %1341 = vmatprep.subr.bf16.mxu0 %v2357_v0 }
 0x160   :  { %1301 = vmatpush1.bf16.msra.mxu1 %v2352_v1  ;;  %1342 = vmatpush1.bf16.msra.mxu0 %v2355_v2  ;;  %v2406_v1 = vld [vmem:[#allocation12 + $0xa8] ss:$12 sps:$4 sm:$0xff]   ;;  %v2434_v2 = vld [vmem:[#allocation12 + $0xb0] ss:$12 sps:$4 sm:$0xff]  }
 0x161   :  { %1302 = vmatprep.subr.bf16.mxu1 %v2360_v3  ;;  %1343 = vmatprep.subr.bf16.mxu0 %v2363_v4 }
 0x164   :  { %1303 = vmatpush2.bf16.msra.mxu1 %v2358_v5  ;;  %1344 = vmatpush2.bf16.msra.mxu0 %v2361_v6  ;;  %v2411_v5 = vld [vmem:[#allocation12 + $0x94] ss:$12 sps:$4 sm:$0xff]   ;;  %v2438_v6 = vld [vmem:[#allocation12 + $0x158] ss:$12 sps:$4 sm:$0xff]  }
 0x165   :  { %1304 = vmatprep.subr.bf16.mxu1 %v2366_v7  ;;  %1345 = vmatprep.subr.bf16.mxu0 %v2369_v8  ;;  %v2409_v7 = vld [vmem:[#allocation12 + $0x90] ss:$12 sps:$4 sm:$0xff]   ;;  %v2439_v8 = vld [vmem:[#allocation12 + $0x98] ss:$12 sps:$4 sm:$0xff]  }
 0x168   :  { %1305 = vmatpush2.bf16.msra.mxu1 %v2364_v9  ;;  %1346 = vmatpush2.bf16.msra.mxu0 %v2367_v10  ;;  %v2414_v9 = vld [vmem:[#allocation12 + $0x7c] ss:$12 sps:$4 sm:$0xff]   ;;  %v2443_v10 = vld [vmem:[#allocation12 + $0x140] ss:$12 sps:$4 sm:$0xff]  }
 0x169   :  { %1306 = vmatprep.subr.bf16.mxu1 %v2372_v11  ;;  %1347 = vmatprep.subr.bf16.mxu0 %v2375_v12  ;;  %v2412_v11 = vld [vmem:[#allocation12 + $0x78] ss:$12 sps:$4 sm:$0xff]   ;;  %v2444_v12 = vld [vmem:[#allocation12 + $0x80] ss:$12 sps:$4 sm:$0xff]  }
 0x16c   :  { %1307 = vmatpush2.bf16.msra.mxu1 %v2370_v13  ;;  %1348 = vmatpush2.bf16.msra.mxu0 %v2373_v14  ;;  %v2417_v13 = vld [vmem:[#allocation12 + $0x64] ss:$12 sps:$4 sm:$0xff]   ;;  %v2448_v14 = vld [vmem:[#allocation12 + $0x128] ss:$12 sps:$4 sm:$0xff]  }
 0x16d   :  { %1308 = vmatprep.subr.bf16.mxu1 %v2378_v15  ;;  %1349 = vmatprep.subr.bf16.mxu0 %v2381_v16  ;;  %v2415_v15 = vld [vmem:[#allocation12 + $0x60] ss:$12 sps:$4 sm:$0xff]   ;;  %v2449_v16 = vld [vmem:[#allocation12 + $0x68] ss:$12 sps:$4 sm:$0xff]  }
 0x170   :  { %1309 = vmatpush2.bf16.msra.mxu1 %v2376_v17  ;;  %1350 = vmatpush2.bf16.msra.mxu0 %v2379_v18  ;;  %v2420_v17 = vld [vmem:[#allocation12 + $0x4c] ss:$12 sps:$4 sm:$0xff]   ;;  %v2453_v18 = vld [vmem:[#allocation12 + $0x110] ss:$12 sps:$4 sm:$0xff]  }
 0x171   :  { %1310 = vmatprep.subr.bf16.mxu1 %v2384_v19  ;;  %1351 = vmatprep.subr.bf16.mxu0 %v2387_v20  ;;  %v2418_v19 = vld [vmem:[#allocation12 + $0x48] ss:$12 sps:$4 sm:$0xff]   ;;  %v2454_v20 = vld [vmem:[#allocation12 + $0x50] ss:$12 sps:$4 sm:$0xff]  }
 0x174   :  { %1311 = vmatpush2.bf16.msra.mxu1 %v2382_v23  ;;  %1352 = vmatpush2.bf16.msra.mxu0 %v2385_v25  ;;  %v2423_v23 = vld [vmem:[#allocation12 + $0x34] ss:$12 sps:$4 sm:$0xff]   ;;  %v2421_v25 = vld [vmem:[#allocation12 + $0x30] ss:$12 sps:$4 sm:$0xff]  }
 0x175   :  { %1312 = vmatprep.subr.bf16.mxu1 %v2390_v26  ;;  %1353 = vmatprep.subr.bf16.mxu0 %v2393_v27  ;;  %v2426_v26 = vld [vmem:[#allocation12 + $0x1c] ss:$12 sps:$4 sm:$0xff]   ;;  %v2424_v27 = vld [vmem:[#allocation12 + $0x18] ss:$12 sps:$4 sm:$0xff]  }
 0x178   :  { %1313 = vmatpush2.bf16.msra.mxu1 %v2388_v28  ;;  %1354 = vmatpush2.bf16.msra.mxu0 %v2391_v29  ;;  %v2429_v28 = vld [vmem:[#allocation12 + $0x4] ss:$12 sps:$4 sm:$0xff]   ;;  %v2427_v29 = vld [vmem:[#allocation12] ss:$12 sps:$4 sm:$0xff]  }
 0x179   :  { %1314 = vmatprep.subr.bf16.mxu1 %v2396_v30  ;;  %1355 = vmatprep.subr.bf16.mxu0 %v2399_v31  ;;  %v2432_v30 = vld [vmem:[#allocation12 + $0x16c] ss:$12 sps:$4 sm:$0xff]   ;;  %v2430_v31 = vld [vmem:[#allocation12 + $0x168] ss:$12 sps:$4 sm:$0xff]  }
 0x17c   :  { %1315 = vmatpush2.bf16.msra.mxu1 %v2394_v32  ;;  %1356 = vmatpush2.bf16.msra.mxu0 %v2397_v33  ;;  %v2437_v32 = vld [vmem:[#allocation12 + $0x154] ss:$12 sps:$4 sm:$0xff]   ;;  %v2435_v33 = vld [vmem:[#allocation12 + $0x150] ss:$12 sps:$4 sm:$0xff]  }
 0x17d   :  { %1316 = vmatprep.subr.bf16.mxu1 %v2402_v34  ;;  %1357 = vmatprep.subr.bf16.mxu0 %v2405_v35  ;;  %v2442_v34 = vld [vmem:[#allocation12 + $0x13c] ss:$12 sps:$4 sm:$0xff]   ;;  %v2440_v35 = vld [vmem:[#allocation12 + $0x138] ss:$12 sps:$4 sm:$0xff]  }
 0x180   :  { %1317 = vmatpush2.bf16.msra.mxu1 %v2400_v36  ;;  %1358 = vmatpush2.bf16.msra.mxu0 %v2403_v37  ;;  %v2447_v36 = vld [vmem:[#allocation12 + $0x124] ss:$12 sps:$4 sm:$0xff]   ;;  %v2445_v37 = vld [vmem:[#allocation12 + $0x120] ss:$12 sps:$4 sm:$0xff]  }
 0x181   :  { %1644 = vmatprep.subr.bf16.mxu1 %v2408_v38  ;;  %2129 = vmatprep.subr.bf16.mxu0 %v2433_v39  ;;  %v2452_v38 = vld [vmem:[#allocation12 + $0x10c] ss:$12 sps:$4 sm:$0xff]   ;;  %v2450_v39 = vld [vmem:[#allocation12 + $0x108] ss:$12 sps:$4 sm:$0xff]  }
 0x203   :  { %v899_v47 = vpop.f32.mrf.mxu1  ;;  %v940_v48 = vpop.f32.mrf.mxu0 }
 0x204   :  { %v900_v49 = vadd.f32 %v899_v47, %v528_v43  ;;  %v941_v50 = vadd.f32 %v940_v48, %v536_v44  ;;  %v2455_v43 = vld [vmem:[#allocation12 + $0xf0] ss:$12 sps:$4 sm:$0xff]   ;;  %v2459_v44 = vld [vmem:[#allocation12 + $0x38] ss:$12 sps:$4 sm:$0xff]   ;;  %v2464_v48 = vld [vmem:[#allocation12 + $0x20] ss:$12 sps:$4 sm:$0xff]  }
 0x205   :  { %v901_v51 = vpop.f32.mrf.mxu1  ;;  %v942_v52 = vpop.f32.mrf.mxu0  ;;  %v2460_v47 = vld [vmem:[#allocation12 + $0xd8] ss:$12 sps:$4 sm:$0xff]  }
 0x206   :  { %v902_v53 = vadd.f32 %v901_v51, %v532_v45  ;;  %v943_v54 = vadd.f32 %v942_v52, %v540_v46  ;;  %v947_v55 = vmax.f32 %v900_v49, 0.0  ;;  %v949_v56 = vmax.f32 %v941_v50, 0.0  ;;  %v2462_v45 = vld [vmem:[#allocation12 + $0xdc] ss:$12 sps:$4 sm:$0xff]   ;;  %v2463_v46 = vld [vmem:[#allocation12 + $0xe0] ss:$12 sps:$4 sm:$0xff]  }
 0x207   :  { %v903_v57 = vpop.f32.mrf.mxu1  ;;  %v944_v58 = vpop.f32.mrf.mxu0  ;;  %v2467_v49 = vld [vmem:[#allocation12 + $0xc4] ss:$12 sps:$4 sm:$0xff]   ;;  %v2468_v50 = vld [vmem:[#allocation12 + $0xc8] ss:$12 sps:$4 sm:$0xff]   ;;  %v2465_v51 = vld [vmem:[#allocation12 + $0xc0] ss:$12 sps:$4 sm:$0xff]  }
 0x208   :  { %v948_v59 = vmax.f32 %v902_v53, 0.0  ;;  %v950_v60 = vmax.f32 %v943_v54, 0.0  ;;  %v951_v3 = vpack.c.bf16 %v947_v55, %v947_v55  ;;  %v953_v4 = vpack.c.bf16 %v949_v56, %v949_v56  ;;  %v2469_v52 = vld [vmem:[#allocation12 + $0x8] ss:$12 sps:$4 sm:$0xff]   ;;  %v2470_v53 = vld [vmem:[#allocation14 + $0x78] sm:$0xff]  }
 0x209   :  { %v904_v61 = vpop.f32.mrf.mxu1  ;;  %v945_v62 = vpop.f32.mrf.mxu0  ;;  %v286_v54 = vld [vmem:[%s2833_s6] sm:$0x3] }
 0x20a   :  { %v952_v63 = vpack.c.bf16 %v948_v59, %v948_v59  ;;  %v954_v0 = vpack.c.bf16 %v950_v60, %v950_v60  ;;  %v959_v55 = vrot.slane %v286_v54, %v2784_v22  ;;  %v963_v56 = vrot.slane %v286_v54, %v2787_v24 }
 0x20c   :  { %1318 = vmatprep.mubr.bf16.mxu1 %v952_v63  ;;  %1359 = vmatprep.mubr.bf16.mxu0 %v954_v0 }
 0x20d   :  { %1319 = vmatmul.mubr.bf16.vlgmr.msra.gmra.mxu1 %v951_v3  ;;  %1360 = vmatmul.mubr.bf16.vlgmr.msra.gmra.mxu0 %v953_v4 }
 0x20e   :  { %1645 = vmatpush1.bf16.msra.mxu1 %v2406_v1  ;;  %2130 = vmatpush3.bf16.msra.mxu0 %v2434_v2 }
 0x20f   :  { %1646 = vmatprep.subr.bf16.mxu1 %v2411_v5  ;;  %2131 = vmatprep.subr.bf16.mxu0 %v2438_v6 }
 0x212   :  { %1647 = vmatpush1.bf16.msra.mxu1 %v2409_v7  ;;  %2132 = vmatpush3.bf16.msra.mxu0 %v2439_v8  ;;  %v2471_v8 = vld [vmem:[#allocation14 + $0x38] sm:$0xff]  }
 0x213   :  { %1648 = vmatprep.subr.bf16.mxu1 %v2414_v9  ;;  %2133 = vmatprep.subr.bf16.mxu0 %v2443_v10  ;;  %v2472_v10 = vld [vmem:[#allocation14 + $0x70] sm:$0xff]  }
 0x216   :  { %1649 = vmatpush1.bf16.msra.mxu1 %v2412_v11  ;;  %2134 = vmatpush3.bf16.msra.mxu0 %v2444_v12  ;;  %v2473_v11 = vld [vmem:[#allocation14 + $0x30] sm:$0xff]   ;;  %v2474_v12 = vld [vmem:[#allocation14 + $0x68] sm:$0xff]  }
 0x217   :  { %1650 = vmatprep.subr.bf16.mxu1 %v2417_v13  ;;  %2135 = vmatprep.subr.bf16.mxu0 %v2448_v14  ;;  %v2475_v13 = vld [vmem:[#allocation14 + $0x28] sm:$0xff]   ;;  %v2476_v14 = vld [vmem:[#allocation14 + $0x60] sm:$0xff]  }
 0x21a   :  { %1651 = vmatpush1.bf16.msra.mxu1 %v2415_v15  ;;  %2136 = vmatpush3.bf16.msra.mxu0 %v2449_v16  ;;  %v2477_v15 = vld [vmem:[#allocation14 + $0x20] sm:$0xff]   ;;  %v2478_v16 = vld [vmem:[#allocation14 + $0x58] sm:$0xff]  }
 0x21b   :  { %1652 = vmatprep.subr.bf16.mxu1 %v2420_v17  ;;  %2137 = vmatprep.subr.bf16.mxu0 %v2453_v18  ;;  %v2479_v17 = vld [vmem:[#allocation14 + $0x18] sm:$0xff]   ;;  %v2480_v18 = vld [vmem:[#allocation14 + $0x50] sm:$0xff]  }
 0x21e   :  { %1653 = vmatpush1.bf16.msra.mxu1 %v2418_v19  ;;  %2138 = vmatpush3.bf16.msra.mxu0 %v2454_v20  ;;  %v2481_v19 = vld [vmem:[#allocation14 + $0x10] sm:$0xff]   ;;  %v2482_v20 = vld [vmem:[#allocation14 + $0x48] sm:$0xff]  }
 0x21f   :  { %1654 = vmatprep.subr.bf16.mxu1 %v2423_v23  ;;  %2139 = vmatprep.subr.bf16.mxu0 %v2458_v42  ;;  %v2483_v23 = vld [vmem:[#allocation14 + $0x8] sm:$0xff]  }
 0x222   :  { %1655 = vmatpush1.bf16.msra.mxu1 %v2421_v25  ;;  %2140 = vmatpush3.bf16.msra.mxu0 %v2459_v44  ;;  %v2484_v25 = vld [vmem:[#allocation14 + $0x40] sm:$0xff]  }
 0x223   :  { %1656 = vmatprep.subr.bf16.mxu1 %v2426_v26  ;;  %2141 = vmatprep.subr.bf16.mxu0 %v2463_v46  ;;  %v2485_v26 = vld [vmem:[#allocation14] sm:$0xff]  }
 0x226   :  { %1657 = vmatpush1.bf16.msra.mxu1 %v2424_v27  ;;  %2142 = vmatpush3.bf16.msra.mxu0 %v2464_v48  ;;  %v351_v27 = vld [vmem:[%s2835_s8] sm:$0x7] }
 0x227   :  { %1658 = vmatprep.subr.bf16.mxu1 %v2429_v28  ;;  %2143 = vmatprep.subr.bf16.mxu0 %v2468_v50  ;;  %v1376_v28 = vrot.slane %v351_v27, %v2784_v22  ;;  %v2128_v22 = vld [vmem:[%s2838_s11] ss:$0 sm:$0xff] }
 0x22a   :  { %1659 = vmatpush1.bf16.msra.mxu1 %v2427_v29  ;;  %2144 = vmatpush3.bf16.msra.mxu0 %v2469_v52  ;;  %v1380_v29 = vrot.slane %v351_v27, %v2787_v24 }
 0x22b   :  { %1660 = vmatprep.subr.bf16.mxu1 %v2432_v30  ;;  %2151 = vmatprep.subr.bf16.mxu0 %v2470_v53  ;;  %v2111_v53 = vld [vmem:[%s2837_s10] ss:$0 sm:$0xff] }
 0x22e   :  { %1661 = vmatpush2.bf16.msra.mxu1 %v2430_v31 }
 0x22f   :  { %1662 = vmatprep.subr.bf16.mxu1 %v2437_v32 }
 0x232   :  { %1663 = vmatpush2.bf16.msra.mxu1 %v2435_v33  ;;  %v1384_v33 = vrot.slane %v351_v27, %v535_v40  ;;  %v1892_v40 = vstv %s2839_s12  ;;  %s2678_s12 = smov [#allocation15]  }
 0x233   :  { %1664 = vmatprep.subr.bf16.mxu1 %v2442_v34 }
 0x236   :  { %1665 = vmatpush2.bf16.msra.mxu1 %v2440_v35 }
 0x237   :  { %1666 = vmatprep.subr.bf16.mxu1 %v2447_v36 }
 0x23a   :  { %1667 = vmatpush2.bf16.msra.mxu1 %v2445_v37 }
 0x23b   :  { %1668 = vmatprep.subr.bf16.mxu1 %v2452_v38 }
 0x23e   :  { %1669 = vmatpush2.bf16.msra.mxu1 %v2450_v39 }
 0x23f   :  { %1670 = vmatprep.subr.bf16.mxu1 %v2457_v41 }
 0x242   :  { %1671 = vmatpush2.bf16.msra.mxu1 %v2455_v43 }
 0x243   :  { %1672 = vmatprep.subr.bf16.mxu1 %v2462_v45 }
 0x246   :  { %1673 = vmatpush2.bf16.msra.mxu1 %v2460_v47 }
 0x247   :  { %1674 = vmatprep.subr.bf16.mxu1 %v2467_v49 }
 0x24a   :  { %1675 = vmatpush2.bf16.msra.mxu1 %v2465_v51 }
 0x2cd   :  { %v1320_v57 = vpop.f32.mrf.mxu1  ;;  %v1361_v58 = vpop.f32.mrf.mxu0 }
 0x2ce   :  { %v1321_v59 = vadd.f32 %v1320_v57, %v959_v55 }
 0x2cf   :  { %v1322_v60 = vpop.f32.mrf.mxu1  ;;  %v1363_v61 = vpop.f32.mrf.mxu0 }
 0x2d0   :  { %v1362_v62 = vadd.f32 %v1361_v58, %v1321_v59  ;;  %v1323_v63 = vadd.f32 %v1322_v60, %v963_v56 }
 0x2d1   :  { %v1324_v0 = vpop.f32.mrf.mxu1  ;;  %v1365_v1 = vpop.f32.mrf.mxu0 }
 0x2d2   :  { %v1364_v2 = vadd.f32 %v1363_v61, %v1323_v63  ;;  %v1368_v3 = vmax.f32 %v1362_v62, 0.0 }
 0x2d3   :  { %v1325_v4 = vpop.f32.mrf.mxu1  ;;  %v1366_v5 = vpop.f32.mrf.mxu0 }
 0x2d4   :  { %v1369_v6 = vmax.f32 %v1364_v2, 0.0  ;;  %v1370_v9 = vpack.c.bf16 %v1368_v3, %v1368_v3 }
 0x2d6   :  { %v1371_v7 = vpack.c.bf16 %v1369_v6, %v1369_v6 }
 0x2d8   :  { %1676 = vmatprep.mubr.bf16.mxu1 %v1371_v7  ;;  %1717 = vmatprep.mubr.bf16.mxu0 %v1371_v7 }
 0x2d9   :  { %1677 = vmatmul.mubr.bf16.vlgmr.msra.gmra.mxu1 %v1370_v9  ;;  %1718 = vmatmul.mubr.bf16.vlgmr.msra.gmra.mxu0 %v1370_v9 }
 0x2da   :  { %2152 = vmatpush3.bf16.msra.mxu0 %v2471_v8 }
 0x2db   :  { %2153 = vmatprep.subr.bf16.mxu0 %v2472_v10 }
 0x2de   :  { %2154 = vmatpush3.bf16.msra.mxu0 %v2473_v11 }
 0x2df   :  { %2155 = vmatprep.subr.bf16.mxu0 %v2474_v12 }
 0x2e2   :  { %2156 = vmatpush3.bf16.msra.mxu0 %v2475_v13 }
 0x2e3   :  { %2157 = vmatprep.subr.bf16.mxu0 %v2476_v14 }
 0x2e6   :  { %2158 = vmatpush3.bf16.msra.mxu0 %v2477_v15 }
 0x2e7   :  { %2159 = vmatprep.subr.bf16.mxu0 %v2478_v16 }
 0x2ea   :  { %2160 = vmatpush3.bf16.msra.mxu0 %v2479_v17 }
 0x2eb   :  { %2161 = vmatprep.subr.bf16.mxu0 %v2480_v18 }
 0x2ee   :  { %2162 = vmatpush3.bf16.msra.mxu0 %v2481_v19 }
 0x2ef   :  { %2163 = vmatprep.subr.bf16.mxu0 %v2482_v20 }
 0x2f2   :  { %2164 = vmatpush3.bf16.msra.mxu0 %v2483_v23 }
 0x2f3   :  { %2165 = vmatprep.subr.bf16.mxu0 %v2484_v25 }
 0x2f6   :  { %2166 = vmatpush3.bf16.msra.mxu0 %v2485_v26 }
 0x399   :  { %v1678_v30 = vpop.f32.mrf.mxu1  ;;  %v2145_v31 = vpop.f32.mrf.mxu0 }
 0x39a   :  { %v1679_v32 = vadd.f32 %v1678_v30, %v1376_v28 }
 0x39b   :  { %v1680_v34 = vpop.f32.mrf.mxu1  ;;  %v2146_v35 = vpop.f32.mrf.mxu0 }
 0x39c   :  { %v1681_v36 = vadd.f32 %v1680_v34, %v1380_v29  ;;  %v2147_v37 = vadd.f32 %v2146_v35, %v2145_v31  ;;  %v1725_v38 = vmax.f32 %v1679_v32, 0.0 }
 0x39d   :  { %v1682_v39 = vpop.f32.mrf.mxu1  ;;  %v2148_v41 = vpop.f32.mrf.mxu0 }
 0x39e   :  { %v1726_v42 = vmax.f32 %v1681_v36, 0.0  ;;  %v1720_v43 = vadd.f32 %v2147_v37, %v1384_v33  ;;  %v1728_v47 = vpack.c.bf16 %v1725_v38, %v1725_v38 }
 0x39f   :  { %v1683_v44 = vpop.f32.mrf.mxu1  ;;  %v2149_v45 = vpop.f32.mrf.mxu0 }
 0x3a0   :  { %v1729_v24 = vpack.c.bf16 %v1726_v42, %v1726_v42  ;;  %v1727_v46 = vmax.f32 %v1720_v43, 0.0 }
 0x3a2   :  { %1864 = vmatprep.mubr.bf16.mxu0 %v1729_v24  ;;  %v1889_v21 = vmul.f32 %v2128_v22, %v1727_v46 }
 0x3a3   :  { %1865 = vmatmul.mubr.bf16.vlgmr.msra.gmra.mxu0 %v1728_v47 }
 0x3a4   :  { %1890 = vadd.xlane.f32.xlu1 %v1889_v21 }
 0x42d   :  { %v1891_v48 = vpop.xlane.xlu1 %1890 }
 0x42e   :  { %v1893_v49 = vadd.f32 %v1892_v40, %v1891_v48 }
 0x430   :  { %2486 = vtanh.f32 %v1893_v49 }
 0x43d   :  { %v2487_v50 = vpop.eup %2486 }
 0x43e   :  { %1896 = vst.msk [vmem:[%s2841_s14] sm:$0xff] %vm1895_vm0, %v2487_v50  ;;  %s1903_s14 = sshll.u32 %s2678_s12, 4  ;;  %s1904_s14 = int_to_ptr.vmem [resolvable:$true] %s1903_s14 }
 0x43f   :  { %s2632_s10 = scalar_lea.vmem %s1904_s14, 64  ;;  %p2637_p8 = scmp.lt.s32.totalorder %s1904_s14, %s1904_s14 }
 0x440   :  { %p2633_p7 = scmp.ne.s32.totalorder %s1904_s14, %s2632_s10  ;;  %p2638_p9 = scmp.lt.s32.totalorder %s2632_s10, %s2632_s10 }
 0x442   :  { %p2639_p10 = por %p2638_p9, %p2637_p8 }
 0x444   :  { %p2640_p11 = pnand %p2639_p10, %p2633_p7 }
 0x463   :  { %v2167_v51 = vpop.f32.mrf.mxu0 }
 0x465   :  { %v2168_v52 = vpop.f32.mrf.mxu0 }
 0x466   :  { %v2169_v54 = vadd.f32 %v2168_v52, %v2167_v51 }
 0x467   :  { %v2170_v55 = vpop.f32.mrf.mxu0 }
 0x468   :  { %v1867_v56 = vadd.f32 %v2169_v54, %v2111_v53 }
 0x469   :  { %v2171_v57 = vpop.f32.mrf.mxu0 }
 0x46a   :  { %1872 = vmax.xlane.f32.xlu0 %v1867_v56 }
 0x4f3   :  { %v1873_v58 = vpop.xlane.xlu0 %1872 }
 0x4f4   :  { %v1874_v59 = vsub.f32 %v1867_v56, %v1873_v58 }
 0x4f6   :  { %v1875_v60 = vmul.f32 1.442695, %v1874_v59 }
 0x4f8   :  { %2488 = vpow2.f32 %v1875_v60 }
 0x505   :  { %v2489_v61 = vpop.eup %2488 }
 0x506   :  { %1877 = vadd.xlane.f32.xlu0 %v2489_v61 }
 0x58f   :  { %v1878_v62 = vpop.xlane.xlu0 %1877 }
 0x590   :  { %2490 = vrcp.f32 %v1878_v62 }
 0x59d   :  { %v2491_v63 = vpop.eup %2490 }
 0x59e   :  { %v1880_v0 = vmul.f32 %v2491_v63, %v2489_v61 }
 0x5a0   :  { %v1881_v1 = vpack.c.bf16 %v1880_v0, %v1880_v0 }
 0x5a2   :  { %1882 = vst [vmem:[#allocation15] sm:$0xf] %v1881_v1 }
 0x5a3   :  { %2643 = shalt.err (!%p2640_p11)
}
 0x5a4   :  { %1906 = dma.vmem_to_hbm [thread:$0]  %s1904_s14, 64, %s2840_s13, [#allocation5]  }
 0x5a5   :  { %2660 = dma.done.wait [#allocation5], 64  }
 0x5a6   :  { %2661 = vsyncadd [#allocation5], 4294967232 }
 0x5a7   :  { %1914 = vsyncpa [#allocation4], 1 }
 0x5a8   :  { %1915 = vsyncpa [#allocation7], 1 }
 0x5a9   :  { %1916 = vsyncpa [#allocation10], 1 }
 0x5aa   :  { %1917 = vsyncpa [#allocation13], 1 }
 0x5ab   :  { %1918 = vsyncpa [#allocation5], 1 }

// kernel: tpu_custom_call.1
= control target key start
LH: loop header
LB: loop body
LE: loop exit
PB: predicated region body
PF: predicated region fallthrough
CT: control target
= control target key end

     0   :  { %21 = vsyncpa [#allocation4], 0  ;;  %s2827_s0 = inlined_call_operand.hbm [shape: bf16[8,128], index: 0, kind: input, shape index: {}]   ;;  %s2828_s1 = inlined_call_operand.hbm [shape: bf16[128,256], index: 1, kind: input, shape index: {}]   ;;  %s2829_s2 = inlined_call_operand.hbm [shape: f32[1,256], index: 2, kind: input, shape index: {}]   ;;  %s2830_s3 = inlined_call_operand.hbm [shape: bf16[256,512], index: 3, kind: input, shape index: {}]   ;;  %s2831_s4 = inlined_call_operand.vmem [shape: f32[1,512], index: 4, kind: input, shape index: {}]   ;;  %s2832_s5 = inlined_call_operand.hbm [shape: bf16[512,256], index: 5, kind: input, shape index: {}]   ;;  %s2833_s6 = inlined_call_operand.vmem [shape: f32[1,256], index: 6, kind: input, shape index: {}]   ;;  %s2834_s7 = inlined_call_operand.hbm [shape: bf16[256,384], index: 7, kind: input, shape index: {}]   ;;  %s2835_s8 = inlined_call_operand.vmem [shape: f32[1,384], index: 8, kind: input, shape index: {}]   ;;  %s2836_s9 = inlined_call_operand.hbm [shape: bf16[256,128], index: 9, kind: input, shape index: {}]   ;;  %s2837_s10 = inlined_call_operand.vmem [shape: f32[1,128], index: 10, kind: input, shape index: {}]   ;;  %s2838_s11 = inlined_call_operand.vmem [shape: f32[1,128], index: 11, kind: input, shape index: {}]   ;;  %s2839_s12 = inlined_call_operand.<no memory space> [shape: f32[1], index: 12, kind: input, shape index: {}]   ;;  %s2840_s13 = inlined_call_operand.hbm [shape: bf16[8,128], index: 13, kind: output, shape index: {0}]   ;;  %s2841_s14 = inlined_call_operand.vmem [shape: f32[8,1], index: 14, kind: output, shape index: {1}]  }
   0x1   :  { %22 = vsyncpa [#allocation7], 0 }
   0x2   :  { %23 = vsyncpa [#allocation10], 0 }
   0x3   :  { %24 = vsyncpa [#allocation13], 0 }
   0x4   :  { %25 = vsyncpa [#allocation5], 0  ;;  %s2662_s29 = smov [#allocation6]  }
   0x5   :  { %s41_s30 = sshll.u32 %s2662_s29, 4  ;;  %s42_s30 = int_to_ptr.vmem [resolvable:$true] %s41_s30 }
   0x6   :  { %s2500_s15 = scalar_lea.vmem %s42_s30, 2048  ;;  %p2505_p1 = scmp.lt.s32.totalorder %s42_s30, %s42_s30 }
   0x7   :  { %p2501_p0 = scmp.ne.s32.totalorder %s42_s30, %s2500_s15  ;;  %p2506_p2 = scmp.lt.s32.totalorder %s2500_s15, %s2500_s15 }
   0x9   :  { %p2507_p3 = por %p2506_p2, %p2505_p1 }
   0xb   :  { %p2508_p4 = pnand %p2507_p3, %p2501_p0 }
   0xd   :  { %2511 = shalt.err (!%p2508_p4)
}
   0xe   :  { %s2663_s16 = smov 128   ;;  %s2664_s17 = smov 8  }
   0xf   :  { %47 = dma.hbm_to_vmem [thread:$0]  %s2828_s1, 2048, %s42_s30, [#allocation7], %s2663_s16, %s2663_s16, %s2664_s17  }
  0x10   :  { %s2665_s20 = smov [#allocation9]  }
  0x11   :  { %s63_s21 = sshll.u32 %s2665_s20, 4  ;;  %s64_s21 = int_to_ptr.vmem [resolvable:$true] %s63_s21 }
  0x12   :  { %s2520_s22 = scalar_lea.vmem %s64_s21, 8192  ;;  %p2525_p6 = scmp.lt.s32.totalorder %s64_s21, %s64_s21 }
  0x13   :  { %p2521_p5 = scmp.ne.s32.totalorder %s64_s21, %s2520_s22  ;;  %p2526_p7 = scmp.lt.s32.totalorder %s2520_s22, %s2520_s22 }
  0x15   :  { %p2527_p8 = por %p2526_p7, %p2525_p6 }
  0x17   :  { %p2528_p9 = pnand %p2527_p8, %p2521_p5 }
  0x19   :  { %2531 = shalt.err (!%p2528_p9)
}
  0x1a   :  { %s2666_s23 = smov 256   ;;  %s2667_s24 = smov 16  }
  0x1b   :  { %69 = dma.hbm_to_vmem [thread:$0]  %s2830_s3, 8192, %s64_s21, [#allocation10], %s2666_s23, %s2666_s23, %s2667_s24  }
  0x1c   :  { %s2668_s27 = smov [#allocation12]  }
  0x1d   :  { %s91_s28 = sshll.u32 %s2668_s27, 4  ;;  %s92_s28 = int_to_ptr.vmem [resolvable:$true] %s91_s28 }
  0x1e   :  { %s2540_s1 = scalar_lea.vmem %s92_s28, 6144  ;;  %p2545_p11 = scmp.lt.s32.totalorder %s92_s28, %s92_s28 }
  0x1f   :  { %p2541_p10 = scmp.ne.s32.totalorder %s92_s28, %s2540_s1  ;;  %p2546_p12 = scmp.lt.s32.totalorder %s2540_s1, %s2540_s1 }
  0x21   :  { %p2547_p13 = por %p2546_p12, %p2545_p11 }
  0x23   :  { %p2548_p0 = pnand %p2547_p13, %p2541_p10 }
  0x25   :  { %2551 = shalt.err (!%p2548_p0)
}
  0x26   :  { %s2669_s29 = smov 192   ;;  %s2670_s30 = smov 12  }
  0x27   :  { %97 = dma.hbm_to_vmem [thread:$0]  %s2834_s7, 6144, %s92_s28, [#allocation13], %s2669_s29, %s2669_s29, %s2670_s30  }
  0x28   :  { %s2671_s19 = smov [#allocation3]   ;;  %s2672_s3 = smov [#allocation8]  }
  0x29   :  { %s32_s20 = sshll.u32 %s2671_s19, 4  ;;  %s54_s21 = sshll.u32 %s2672_s3, 4  ;;  %s33_s20 = int_to_ptr.vmem [resolvable:$true] %s32_s20  ;;  %s55_s21 = int_to_ptr.vmem [resolvable:$true] %s54_s21 }
  0x2a   :  { %s2560_s22 = scalar_lea.vmem %s33_s20, 64  ;;  %p2565_p2 = scmp.lt.s32.totalorder %s33_s20, %s33_s20 }
  0x2b   :  { %p2561_p1 = scmp.ne.s32.totalorder %s33_s20, %s2560_s22  ;;  %p2566_p3 = scmp.lt.s32.totalorder %s2560_s22, %s2560_s22 }
  0x2d   :  { %p2567_p4 = por %p2566_p3, %p2565_p2 }
  0x2f   :  { %p2568_p5 = pnand %p2567_p4, %p2561_p1 }
  0x31   :  { %2571 = shalt.err (!%p2568_p5)
}
  0x32   :  { %35 = dma.hbm_to_vmem [thread:$0]  %s2827_s0, 64, %s33_s20, [#allocation4]  }
  0x33   :  { %s2580_s25 = scalar_lea.vmem %s55_s21, 32  ;;  %p2585_p7 = scmp.lt.s32.totalorder %s55_s21, %s55_s21 }
  0x34   :  { %p2581_p6 = scmp.ne.s32.totalorder %s55_s21, %s2580_s25  ;;  %p2586_p8 = scmp.lt.s32.totalorder %s2580_s25, %s2580_s25 }
  0x36   :  { %p2587_p9 = por %p2586_p8, %p2585_p7 }
  0x38   :  { %p2588_p10 = pnand %p2587_p9, %p2581_p6 }
  0x3a   :  { %2591 = shalt.err (!%p2588_p10)
}
  0x3b   :  { %57 = dma.hbm_to_vmem [thread:$0]  %s2829_s2, 32, %s55_s21, [#allocation7]  }
  0x3c   :  { %s2673_s27 = smov [#allocation11]   ;;  %s2674_s1 = smov [#allocation14]  }
  0x3d   :  { %s77_s28 = sshll.u32 %s2673_s27, 4  ;;  %s105_s29 = sshll.u32 %s2674_s1, 4  ;;  %s78_s28 = int_to_ptr.vmem [resolvable:$true] %s77_s28  ;;  %s106_s29 = int_to_ptr.vmem [resolvable:$true] %s105_s29 }
  0x3e   :  { %s2600_s30 = scalar_lea.vmem %s78_s28, 8192  ;;  %p2605_p12 = scmp.lt.s32.totalorder %s78_s28, %s78_s28 }
  0x3f   :  { %p2601_p11 = scmp.ne.s32.totalorder %s78_s28, %s2600_s30  ;;  %p2606_p13 = scmp.lt.s32.totalorder %s2600_s30, %s2600_s30 }
  0x41   :  { %p2607_p0 = por %p2606_p13, %p2605_p12 }
  0x43   :  { %p2608_p1 = pnand %p2607_p0, %p2601_p11 }
  0x45   :  { %2611 = shalt.err (!%p2608_p1)
}
  0x46   :  { %83 = dma.hbm_to_vmem [thread:$0]  %s2832_s5, 8192, %s78_s28, [#allocation10], %s2663_s16, %s2663_s16, %s2664_s17  }
  0x47   :  { %s2620_s2 = scalar_lea.vmem %s106_s29, 2048  ;;  %p2625_p3 = scmp.lt.s32.totalorder %s106_s29, %s106_s29 }
  0x48   :  { %p2621_p2 = scmp.ne.s32.totalorder %s106_s29, %s2620_s2  ;;  %p2626_p4 = scmp.lt.s32.totalorder %s2620_s2, %s2620_s2 }
  0x4a   :  { %p2627_p5 = por %p2626_p4, %p2625_p3 }
  0x4c   :  { %p2628_p6 = pnand %p2627_p5, %p2621_p2 }
  0x4e   :  { %2631 = shalt.err (!%p2628_p6)
}
  0x4f   :  { %s2675_s18 = smov 64   ;;  %s2676_s19 = smov 4  }
  0x50   :  { %111 = dma.hbm_to_vmem [thread:$0]  %s2836_s9, 2048, %s106_s29, [#allocation13], %s2675_s18, %s2675_s18, %s2676_s19  }
  0x51   :  { %2652 = dma.done.wait [#allocation4], 64  }
  0x52   :  { %2653 = vsyncadd [#allocation4], 4294967232 }
  0x53   :  { %2654 = dma.done.wait [#allocation7], 2080  }
  0x54   :  { %2655 = vsyncadd [#allocation7], 4294965216 }
  0x55   :  { %2656 = dma.done.wait [#allocation10], 16384  }
  0x56   :  { %2657 = vsyncadd [#allocation10], 4294950912 }
  0x57   :  { %2658 = dma.done.wait [#allocation13], 8192  }
  0x58   :  { %2659 = vsyncadd [#allocation13], 4294959104  ;;  %v2677_v0 = vmov 0   ;;  %v2190_v1 = vld [vmem:[#allocation6 + $0x74] ss:$8 sps:$4 sm:$0xff]   ;;  %vm1895_vm0 = vcmask 7168  }
  0x59   :  { %511 = vmatprep.mubr.bf16.mxu0 %v2677_v0  ;;  %v2192_v2 = vld [vmem:[#allocation6 + $0x70] ss:$8 sps:$4 sm:$0xff]   ;;  %479 = vmatprep.subr.bf16.mxu0 %v2190_v1  ;;  %v2193_v3 = vld [vmem:[#allocation6 + $0x64] ss:$8 sps:$4 sm:$0xff]   ;;  %v2195_v4 = vld [vmem:[#allocation6 + $0x60] ss:$8 sps:$4 sm:$0xff]  }
  0x5a   :  { %480 = vmatpush1.bf16.msra.mxu0 %v2192_v2  ;;  %v2196_v5 = vld [vmem:[#allocation6 + $0x54] ss:$8 sps:$4 sm:$0xff]   ;;  %v2198_v6 = vld [vmem:[#allocation6 + $0x50] ss:$8 sps:$4 sm:$0xff]   ;;  %v2199_v7 = vld [vmem:[#allocation6 + $0x44] ss:$8 sps:$4 sm:$0xff]  }
  0x5b   :  { %481 = vmatprep.subr.bf16.mxu0 %v2193_v3  ;;  %v2201_v8 = vld [vmem:[#allocation6 + $0x40] ss:$8 sps:$4 sm:$0xff]   ;;  %v2202_v10 = vld [vmem:[#allocation6 + $0x34] ss:$8 sps:$4 sm:$0xff]   ;;  %v2204_v13 = vld [vmem:[#allocation6 + $0x30] ss:$8 sps:$4 sm:$0xff]  }
  0x5c   :  { %v2214_v9 = vld [vmem:[#allocation9 + $0xe4] ss:$16 sps:$4 sm:$0xff]   ;;  %v2219_v11 = vld [vmem:[#allocation9 + $0xe0] ss:$16 sps:$4 sm:$0xff]   ;;  %v2218_v26 = vld [vmem:[#allocation9 + $0xec] ss:$16 sps:$4 sm:$0xff]  }
  0x5d   :  { %865 = vmatprep.subr.bf16.mxu1 %v2214_v9  ;;  %v2220_v12 = vld [vmem:[#allocation9 + $0xc4] ss:$16 sps:$4 sm:$0xff]   ;;  %v2225_v15 = vld [vmem:[#allocation9 + $0xc0] ss:$16 sps:$4 sm:$0xff]   ;;  %v387_v29 = vld [vmem:[#allocation3] sm:$0xf] }
  0x5e   :  { %482 = vmatpush1.bf16.msra.mxu0 %v2195_v4  ;;  %v2205_v14 = vld [vmem:[#allocation6 + $0x24] ss:$8 sps:$4 sm:$0xff]   ;;  %866 = vmatpush1.bf16.msra.mxu1 %v2219_v11  ;;  %v2207_v17 = vld [vmem:[#allocation6 + $0x20] ss:$8 sps:$4 sm:$0xff]   ;;  %v2208_v18 = vld [vmem:[#allocation6 + $0x14] ss:$8 sps:$4 sm:$0xff]  }
  0x5f   :  { %483 = vmatprep.subr.bf16.mxu0 %v2196_v5  ;;  %867 = vmatprep.subr.bf16.mxu1 %v2220_v12  ;;  %v2226_v16 = vld [vmem:[#allocation9 + $0xa4] ss:$16 sps:$4 sm:$0xff]   ;;  %v2231_v19 = vld [vmem:[#allocation9 + $0xa0] ss:$16 sps:$4 sm:$0xff]   ;;  %v2216_v30 = vld [vmem:[#allocation9 + $0xe8] ss:$16 sps:$4 sm:$0xff]  }
  0x60   :  { %v2232_v20 = vld [vmem:[#allocation9 + $0x84] ss:$16 sps:$4 sm:$0xff]   ;;  %v2237_v23 = vld [vmem:[#allocation9 + $0x80] ss:$16 sps:$4 sm:$0xff]   ;;  %v2224_v31 = vld [vmem:[#allocation9 + $0xcc] ss:$16 sps:$4 sm:$0xff]  }
  0x61   :  { %v2210_v21 = vld [vmem:[#allocation6 + $0x10] ss:$8 sps:$4 sm:$0xff]   ;;  %v2211_v22 = vld [vmem:[#allocation6 + $0x4] ss:$8 sps:$4 sm:$0xff]   ;;  %v2213_v25 = vld [vmem:[#allocation6] ss:$8 sps:$4 sm:$0xff]  }
  0x62   :  { %484 = vmatpush1.bf16.msra.mxu0 %v2198_v6  ;;  %868 = vmatpush1.bf16.msra.mxu1 %v2225_v15  ;;  %v2238_v24 = vld [vmem:[#allocation9 + $0x64] ss:$16 sps:$4 sm:$0xff]   ;;  %v2243_v27 = vld [vmem:[#allocation9 + $0x60] ss:$16 sps:$4 sm:$0xff]   ;;  %v2222_v34 = vld [vmem:[#allocation9 + $0xc8] ss:$16 sps:$4 sm:$0xff]  }
  0x63   :  { %485 = vmatprep.subr.bf16.mxu0 %v2199_v7  ;;  %869 = vmatprep.subr.bf16.mxu1 %v2226_v16  ;;  %v2244_v28 = vld [vmem:[#allocation9 + $0x44] ss:$16 sps:$4 sm:$0xff]   ;;  %v2249_v32 = vld [vmem:[#allocation9 + $0x40] ss:$16 sps:$4 sm:$0xff]   ;;  %v2230_v35 = vld [vmem:[#allocation9 + $0xac] ss:$16 sps:$4 sm:$0xff]  }
  0x64   :  { %v2250_v33 = vld [vmem:[#allocation9 + $0x24] ss:$16 sps:$4 sm:$0xff]   ;;  %v2255_v36 = vld [vmem:[#allocation9 + $0x20] ss:$16 sps:$4 sm:$0xff]   ;;  %v2228_v38 = vld [vmem:[#allocation9 + $0xa8] ss:$16 sps:$4 sm:$0xff]  }
  0x65   :  { %v2256_v37 = vld [vmem:[#allocation9 + $0x4] ss:$16 sps:$4 sm:$0xff]   ;;  %v2236_v39 = vld [vmem:[#allocation9 + $0x8c] ss:$16 sps:$4 sm:$0xff]   ;;  %v2261_v40 = vld [vmem:[#allocation9] ss:$16 sps:$4 sm:$0xff]  }
  0x66   :  { %486 = vmatpush1.bf16.msra.mxu0 %v2201_v8  ;;  %870 = vmatpush1.bf16.msra.mxu1 %v2231_v19  ;;  %v2262_v41 = vld [vmem:[#allocation9 + $0x1e4] ss:$16 sps:$4 sm:$0xff]   ;;  %v2234_v42 = vld [vmem:[#allocation9 + $0x88] ss:$16 sps:$4 sm:$0xff]   ;;  %v2242_v43 = vld [vmem:[#allocation9 + $0x6c] ss:$16 sps:$4 sm:$0xff]  }
  0x67   :  { %487 = vmatprep.subr.bf16.mxu0 %v2202_v10  ;;  %871 = vmatprep.subr.bf16.mxu1 %v2232_v20  ;;  %v2267_v44 = vld [vmem:[#allocation9 + $0x1e0] ss:$16 sps:$4 sm:$0xff]   ;;  %v2268_v45 = vld [vmem:[#allocation9 + $0x1c4] ss:$16 sps:$4 sm:$0xff]   ;;  %v2240_v46 = vld [vmem:[#allocation9 + $0x68] ss:$16 sps:$4 sm:$0xff]   ;;  %v389_v20 = vlaneseq }
  0x68   :  { %v2273_v47 = vld [vmem:[#allocation9 + $0x1c0] ss:$16 sps:$4 sm:$0xff]   ;;  %v2248_v48 = vld [vmem:[#allocation9 + $0x4c] ss:$16 sps:$4 sm:$0xff]   ;;  %v2274_v49 = vld [vmem:[#allocation9 + $0x1a4] ss:$16 sps:$4 sm:$0xff]  }
  0x69   :  { %v2246_v50 = vld [vmem:[#allocation9 + $0x48] ss:$16 sps:$4 sm:$0xff]   ;;  %v2279_v51 = vld [vmem:[#allocation9 + $0x1a0] ss:$16 sps:$4 sm:$0xff]   ;;  %v2254_v52 = vld [vmem:[#allocation9 + $0x2c] ss:$16 sps:$4 sm:$0xff]  }
  0x6a   :  { %488 = vmatpush1.bf16.msra.mxu0 %v2204_v13  ;;  %872 = vmatpush1.bf16.msra.mxu1 %v2237_v23  ;;  %v2280_v53 = vld [vmem:[#allocation9 + $0x184] ss:$16 sps:$4 sm:$0xff]   ;;  %v2252_v54 = vld [vmem:[#allocation9 + $0x28] ss:$16 sps:$4 sm:$0xff]   ;;  %v2285_v55 = vld [vmem:[#allocation9 + $0x180] ss:$16 sps:$4 sm:$0xff]  }
  0x6b   :  { %489 = vmatprep.subr.bf16.mxu0 %v2205_v14  ;;  %873 = vmatprep.subr.bf16.mxu1 %v2238_v24  ;;  %v2260_v56 = vld [vmem:[#allocation9 + $0xc] ss:$16 sps:$4 sm:$0xff]   ;;  %v2286_v57 = vld [vmem:[#allocation9 + $0x164] ss:$16 sps:$4 sm:$0xff]   ;;  %v2258_v58 = vld [vmem:[#allocation9 + $0x8] ss:$16 sps:$4 sm:$0xff]  }
  0x6c   :  { %v2291_v59 = vld [vmem:[#allocation9 + $0x160] ss:$16 sps:$4 sm:$0xff]   ;;  %v2266_v60 = vld [vmem:[#allocation9 + $0x1ec] ss:$16 sps:$4 sm:$0xff]   ;;  %v2292_v61 = vld [vmem:[#allocation9 + $0x144] ss:$16 sps:$4 sm:$0xff]  }
  0x6d   :  { %v2264_v62 = vld [vmem:[#allocation9 + $0x1e8] ss:$16 sps:$4 sm:$0xff]   ;;  %v2297_v63 = vld [vmem:[#allocation9 + $0x140] ss:$16 sps:$4 sm:$0xff]   ;;  %v2272_v0 = vld [vmem:[#allocation9 + $0x1cc] ss:$16 sps:$4 sm:$0xff]  }
  0x6e   :  { %490 = vmatpush1.bf16.msra.mxu0 %v2207_v17  ;;  %874 = vmatpush1.bf16.msra.mxu1 %v2243_v27  ;;  %v2270_v1 = vld [vmem:[#allocation9 + $0x1c8] ss:$16 sps:$4 sm:$0xff]   ;;  %v2278_v2 = vld [vmem:[#allocation9 + $0x1ac] ss:$16 sps:$4 sm:$0xff]   ;;  %v2298_v10 = vld [vmem:[#allocation9 + $0x124] ss:$16 sps:$4 sm:$0xff]  }
  0x6f   :  { %491 = vmatprep.subr.bf16.mxu0 %v2208_v18  ;;  %875 = vmatprep.subr.bf16.mxu1 %v2244_v28  ;;  %v2276_v3 = vld [vmem:[#allocation9 + $0x1a8] ss:$16 sps:$4 sm:$0xff]   ;;  %v2284_v4 = vld [vmem:[#allocation9 + $0x18c] ss:$16 sps:$4 sm:$0xff]   ;;  %v2303_v13 = vld [vmem:[#allocation9 + $0x120] ss:$16 sps:$4 sm:$0xff]  }
  0x70   :  { %v2282_v5 = vld [vmem:[#allocation9 + $0x188] ss:$16 sps:$4 sm:$0xff]   ;;  %v2290_v6 = vld [vmem:[#allocation9 + $0x16c] ss:$16 sps:$4 sm:$0xff]   ;;  %v2304_v14 = vld [vmem:[#allocation9 + $0x104] ss:$16 sps:$4 sm:$0xff]  }
  0x71   :  { %v2288_v7 = vld [vmem:[#allocation9 + $0x168] ss:$16 sps:$4 sm:$0xff]   ;;  %v2296_v8 = vld [vmem:[#allocation9 + $0x14c] ss:$16 sps:$4 sm:$0xff]   ;;  %v2309_v17 = vld [vmem:[#allocation9 + $0x100] ss:$16 sps:$4 sm:$0xff]  }
  0x72   :  { %492 = vmatpush1.bf16.msra.mxu0 %v2210_v21  ;;  %876 = vmatpush1.bf16.msra.mxu1 %v2249_v32  ;;  %v2294_v9 = vld [vmem:[#allocation9 + $0x148] ss:$16 sps:$4 sm:$0xff]   ;;  %v2302_v11 = vld [vmem:[#allocation9 + $0x12c] ss:$16 sps:$4 sm:$0xff]   ;;  %v2781_v21 = vshrl.u32 %v389_v20, 7 }
  0x73   :  { %493 = vmatprep.subr.bf16.mxu0 %v2211_v22  ;;  %877 = vmatprep.subr.bf16.mxu1 %v2250_v33  ;;  %v2300_v12 = vld [vmem:[#allocation9 + $0x128] ss:$16 sps:$4 sm:$0xff]   ;;  %v2308_v15 = vld [vmem:[#allocation9 + $0x10c] ss:$16 sps:$4 sm:$0xff]  }
  0x74   :  { %v2306_v16 = vld [vmem:[#allocation9 + $0x108] ss:$16 sps:$4 sm:$0xff]   ;;  %v2312_v18 = vld [vmem:[#allocation11 + $0x74] ss:$8 sps:$4 sm:$0xff]   ;;  %v2784_v22 = vsub.s32 0, %v2781_v21  ;;  %v2787_v24 = vsub.s32 1, %v2781_v21 }
  0x75   :  { %v2315_v19 = vld [vmem:[#allocation11 + $0x174] ss:$8 sps:$4 sm:$0xff]  }
  0x76   :  { %494 = vmatpush1.bf16.msra.mxu0 %v2213_v25  ;;  %878 = vmatpush1.bf16.msra.mxu1 %v2255_v36  ;;  %v156_v23 = vld [vmem:[#allocation8] sm:$0x3]  ;;  %v2310_v36 = vld [vmem:[#allocation11 + $0x70] ss:$8 sps:$4 sm:$0xff]  }
  0x77   :  { %906 = vmatprep.subr.bf16.mxu0 %v2218_v26  ;;  %879 = vmatprep.subr.bf16.mxu1 %v2256_v37  ;;  %v392_v25 = vrot.slane %v156_v23, %v2784_v22  ;;  %v396_v26 = vrot.slane %v156_v23, %v2787_v24  ;;  %v2313_v37 = vld [vmem:[#allocation11 + $0x170] ss:$8 sps:$4 sm:$0xff]   ;;  %v2387_v20 = vld [vmem:[#allocation11 + $0x1b4] ss:$8 sps:$4 sm:$0xff]  }
  0x78   :  { %v2382_v23 = vld [vmem:[#allocation11 + $0xb0] ss:$8 sps:$4 sm:$0xff]  }
  0x79   :  { %512 = vmatmul.mubr.bf16.vlgmr.msra.gmra.mxu0 %v387_v29 }
  0x7a   :  { %907 = vmatpush1.bf16.msra.mxu0 %v2216_v30  ;;  %880 = vmatpush1.bf16.msra.mxu1 %v2261_v40  ;;  %v2321_v40 = vld [vmem:[#allocation11 + $0x164] ss:$8 sps:$4 sm:$0xff]  }
  0x7b   :  { %908 = vmatprep.subr.bf16.mxu0 %v2224_v31  ;;  %881 = vmatprep.subr.bf16.mxu1 %v2262_v41  ;;  %v2316_v41 = vld [vmem:[#allocation11 + $0x60] ss:$8 sps:$4 sm:$0xff]  }
  0x7e   :  { %909 = vmatpush1.bf16.msra.mxu0 %v2222_v34  ;;  %882 = vmatpush2.bf16.msra.mxu1 %v2267_v44  ;;  %v2327_v44 = vld [vmem:[#allocation11 + $0x154] ss:$8 sps:$4 sm:$0xff]  }
  0x7f   :  { %910 = vmatprep.subr.bf16.mxu0 %v2230_v35  ;;  %883 = vmatprep.subr.bf16.mxu1 %v2268_v45  ;;  %v2322_v45 = vld [vmem:[#allocation11 + $0x50] ss:$8 sps:$4 sm:$0xff]  }
  0x82   :  { %911 = vmatpush1.bf16.msra.mxu0 %v2228_v38  ;;  %884 = vmatpush2.bf16.msra.mxu1 %v2273_v47  ;;  %v2330_v47 = vld [vmem:[#allocation11 + $0x44] ss:$8 sps:$4 sm:$0xff]  }
  0x83   :  { %912 = vmatprep.subr.bf16.mxu0 %v2236_v39  ;;  %885 = vmatprep.subr.bf16.mxu1 %v2274_v49  ;;  %v2318_v39 = vld [vmem:[#allocation11 + $0x64] ss:$8 sps:$4 sm:$0xff]   ;;  %v2328_v49 = vld [vmem:[#allocation11 + $0x40] ss:$8 sps:$4 sm:$0xff]  }
  0x86   :  { %913 = vmatpush1.bf16.msra.mxu0 %v2234_v42  ;;  %886 = vmatpush2.bf16.msra.mxu1 %v2279_v51  ;;  %v2319_v42 = vld [vmem:[#allocation11 + $0x160] ss:$8 sps:$4 sm:$0xff]   ;;  %v2336_v51 = vld [vmem:[#allocation11 + $0x34] ss:$8 sps:$4 sm:$0xff]  }
  0x87   :  { %914 = vmatprep.subr.bf16.mxu0 %v2242_v43  ;;  %887 = vmatprep.subr.bf16.mxu1 %v2280_v53  ;;  %v2324_v43 = vld [vmem:[#allocation11 + $0x54] ss:$8 sps:$4 sm:$0xff]   ;;  %v2334_v53 = vld [vmem:[#allocation11 + $0x30] ss:$8 sps:$4 sm:$0xff]  }
  0x8a   :  { %915 = vmatpush1.bf16.msra.mxu0 %v2240_v46  ;;  %888 = vmatpush2.bf16.msra.mxu1 %v2285_v55  ;;  %v2325_v46 = vld [vmem:[#allocation11 + $0x150] ss:$8 sps:$4 sm:$0xff]   ;;  %v2342_v55 = vld [vmem:[#allocation11 + $0x24] ss:$8 sps:$4 sm:$0xff]  }
  0x8b   :  { %916 = vmatprep.subr.bf16.mxu0 %v2248_v48  ;;  %889 = vmatprep.subr.bf16.mxu1 %v2286_v57  ;;  %v2333_v48 = vld [vmem:[#allocation11 + $0x144] ss:$8 sps:$4 sm:$0xff]   ;;  %v2340_v57 = vld [vmem:[#allocation11 + $0x20] ss:$8 sps:$4 sm:$0xff]  }
  0x8e   :  { %917 = vmatpush1.bf16.msra.mxu0 %v2246_v50  ;;  %890 = vmatpush2.bf16.msra.mxu1 %v2291_v59  ;;  %v2331_v50 = vld [vmem:[#allocation11 + $0x140] ss:$8 sps:$4 sm:$0xff]   ;;  %v2348_v59 = vld [vmem:[#allocation11 + $0x14] ss:$8 sps:$4 sm:$0xff]  }
  0x8f   :  { %918 = vmatprep.subr.bf16.mxu0 %v2254_v52  ;;  %891 = vmatprep.subr.bf16.mxu1 %v2292_v61  ;;  %v2339_v52 = vld [vmem:[#allocation11 + $0x134] ss:$8 sps:$4 sm:$0xff]   ;;  %v2346_v61 = vld [vmem:[#allocation11 + $0x10] ss:$8 sps:$4 sm:$0xff]  }
  0x92   :  { %919 = vmatpush1.bf16.msra.mxu0 %v2252_v54  ;;  %892 = vmatpush2.bf16.msra.mxu1 %v2297_v63  ;;  %v2337_v54 = vld [vmem:[#allocation11 + $0x130] ss:$8 sps:$4 sm:$0xff]   ;;  %v2354_v63 = vld [vmem:[#allocation11 + $0x4] ss:$8 sps:$4 sm:$0xff]  }
  0x93   :  { %920 = vmatprep.subr.bf16.mxu0 %v2260_v56  ;;  %893 = vmatprep.subr.bf16.mxu1 %v2298_v10  ;;  %v2345_v56 = vld [vmem:[#allocation11 + $0x124] ss:$8 sps:$4 sm:$0xff]   ;;  %v2367_v10 = vld [vmem:[#allocation11 + $0x1e0] ss:$8 sps:$4 sm:$0xff]  }
  0x96   :  { %921 = vmatpush1.bf16.msra.mxu0 %v2258_v58  ;;  %894 = vmatpush2.bf16.msra.mxu1 %v2303_v13  ;;  %v2343_v58 = vld [vmem:[#allocation11 + $0x120] ss:$8 sps:$4 sm:$0xff]   ;;  %v2370_v13 = vld [vmem:[#allocation11 + $0xd0] ss:$8 sps:$4 sm:$0xff]  }
  0x97   :  { %922 = vmatprep.subr.bf16.mxu0 %v2266_v60  ;;  %895 = vmatprep.subr.bf16.mxu1 %v2304_v14  ;;  %v2351_v60 = vld [vmem:[#allocation11 + $0x114] ss:$8 sps:$4 sm:$0xff]   ;;  %v2373_v14 = vld [vmem:[#allocation11 + $0x1d0] ss:$8 sps:$4 sm:$0xff]  }
  0x9a   :  { %923 = vmatpush2.bf16.msra.mxu0 %v2264_v62  ;;  %896 = vmatpush2.bf16.msra.mxu1 %v2309_v17  ;;  %v2349_v62 = vld [vmem:[#allocation11 + $0x110] ss:$8 sps:$4 sm:$0xff]   ;;  %v2376_v17 = vld [vmem:[#allocation11 + $0xc0] ss:$8 sps:$4 sm:$0xff]  }
  0x9b   :  { %924 = vmatprep.subr.bf16.mxu0 %v2272_v0  ;;  %1286 = vmatprep.subr.bf16.mxu1 %v2312_v18  ;;  %v2357_v0 = vld [vmem:[#allocation11 + $0x104] ss:$8 sps:$4 sm:$0xff]   ;;  %v2379_v18 = vld [vmem:[#allocation11 + $0x1c0] ss:$8 sps:$4 sm:$0xff]  }
  0x9e   :  { %925 = vmatpush2.bf16.msra.mxu0 %v2270_v1  ;;  %v2352_v1 = vld [vmem:[#allocation11] ss:$8 sps:$4 sm:$0xff]  }
  0x9f   :  { %926 = vmatprep.subr.bf16.mxu0 %v2278_v2  ;;  %v2355_v2 = vld [vmem:[#allocation11 + $0x100] ss:$8 sps:$4 sm:$0xff]  }
  0xa2   :  { %927 = vmatpush2.bf16.msra.mxu0 %v2276_v3  ;;  %v2360_v3 = vld [vmem:[#allocation11 + $0xf4] ss:$8 sps:$4 sm:$0xff]  }
  0xa3   :  { %928 = vmatprep.subr.bf16.mxu0 %v2284_v4  ;;  %v2363_v4 = vld [vmem:[#allocation11 + $0x1f4] ss:$8 sps:$4 sm:$0xff]  }
  0xa6   :  { %929 = vmatpush2.bf16.msra.mxu0 %v2282_v5  ;;  %v2358_v5 = vld [vmem:[#allocation11 + $0xf0] ss:$8 sps:$4 sm:$0xff]  }
  0xa7   :  { %930 = vmatprep.subr.bf16.mxu0 %v2290_v6  ;;  %v2361_v6 = vld [vmem:[#allocation11 + $0x1f0] ss:$8 sps:$4 sm:$0xff]  }
  0xaa   :  { %931 = vmatpush2.bf16.msra.mxu0 %v2288_v7  ;;  %v2366_v7 = vld [vmem:[#allocation11 + $0xe4] ss:$8 sps:$4 sm:$0xff]  }
  0xab   :  { %932 = vmatprep.subr.bf16.mxu0 %v2296_v8  ;;  %v2369_v8 = vld [vmem:[#allocation11 + $0x1e4] ss:$8 sps:$4 sm:$0xff]  }
  0xae   :  { %933 = vmatpush2.bf16.msra.mxu0 %v2294_v9  ;;  %v2364_v9 = vld [vmem:[#allocation11 + $0xe0] ss:$8 sps:$4 sm:$0xff]  }
  0xaf   :  { %934 = vmatprep.subr.bf16.mxu0 %v2302_v11  ;;  %v2372_v11 = vld [vmem:[#allocation11 + $0xd4] ss:$8 sps:$4 sm:$0xff]  }
  0xb2   :  { %935 = vmatpush2.bf16.msra.mxu0 %v2300_v12  ;;  %v2375_v12 = vld [vmem:[#allocation11 + $0x1d4] ss:$8 sps:$4 sm:$0xff]  }
  0xb3   :  { %936 = vmatprep.subr.bf16.mxu0 %v2308_v15  ;;  %v2378_v15 = vld [vmem:[#allocation11 + $0xc4] ss:$8 sps:$4 sm:$0xff]  }
  0xb6   :  { %937 = vmatpush2.bf16.msra.mxu0 %v2306_v16  ;;  %v2381_v16 = vld [vmem:[#allocation11 + $0x1c4] ss:$8 sps:$4 sm:$0xff]  }
  0xb7   :  { %1327 = vmatprep.subr.bf16.mxu0 %v2315_v19  ;;  %v2384_v19 = vld [vmem:[#allocation11 + $0xb4] ss:$8 sps:$4 sm:$0xff]  }
 0x139   :  { %v513_v27 = vpop.f32.mrf.mxu0 }
 0x13a   :  { %v514_v28 = vadd.f32 %v513_v27, %v392_v25  ;;  %v2385_v25 = vld [vmem:[#allocation11 + $0x1b0] ss:$8 sps:$4 sm:$0xff]   ;;  %v2393_v27 = vld [vmem:[#allocation11 + $0x1a4] ss:$8 sps:$4 sm:$0xff]  }
 0x13b   :  { %v515_v29 = vpop.f32.mrf.mxu0 }
 0x13c   :  { %v516_v30 = vadd.f32 %v515_v29, %v396_v26  ;;  %v520_v31 = vmax.f32 %v514_v28, 0.0  ;;  %v2390_v26 = vld [vmem:[#allocation11 + $0xa4] ss:$8 sps:$4 sm:$0xff]   ;;  %v2388_v28 = vld [vmem:[#allocation11 + $0xa0] ss:$8 sps:$4 sm:$0xff]  }
 0x13d   :  { %v517_v32 = vpop.f32.mrf.mxu0  ;;  %v2391_v29 = vld [vmem:[#allocation11 + $0x1a0] ss:$8 sps:$4 sm:$0xff]  }
 0x13e   :  { %v521_v33 = vmax.f32 %v516_v30, 0.0  ;;  %v522_v38 = vpack.c.bf16 %v520_v31, %v520_v31  ;;  %v2396_v30 = vld [vmem:[#allocation11 + $0x94] ss:$8 sps:$4 sm:$0xff]   ;;  %v2394_v32 = vld [vmem:[#allocation11 + $0x90] ss:$8 sps:$4 sm:$0xff]  }
 0x13f   :  { %v518_v34 = vpop.f32.mrf.mxu0  ;;  %v2399_v31 = vld [vmem:[#allocation11 + $0x194] ss:$8 sps:$4 sm:$0xff]  }
 0x140   :  { %v523_v35 = vpack.c.bf16 %v521_v33, %v521_v33  ;;  %v2397_v33 = vld [vmem:[#allocation11 + $0x190] ss:$8 sps:$4 sm:$0xff]   ;;  %v2402_v34 = vld [vmem:[#allocation11 + $0x84] ss:$8 sps:$4 sm:$0xff]  }
 0x142   :  { %897 = vmatprep.mubr.bf16.mxu1 %v523_v35  ;;  %938 = vmatprep.mubr.bf16.mxu0 %v523_v35  ;;  %v2405_v35 = vld [vmem:[#allocation11 + $0x184] ss:$8 sps:$4 sm:$0xff]  }
 0x143   :  { %898 = vmatmul.mubr.bf16.vlgmr.msra.gmra.mxu1 %v522_v38  ;;  %939 = vmatmul.mubr.bf16.vlgmr.msra.gmra.mxu0 %v522_v38  ;;  %v2408_v38 = vld [vmem:[#allocation12 + $0xac] ss:$12 sps:$4 sm:$0xff]  }
 0x144   :  { %1287 = vmatpush1.bf16.msra.mxu1 %v2310_v36  ;;  %1328 = vmatpush1.bf16.msra.mxu0 %v2313_v37  ;;  %v2400_v36 = vld [vmem:[#allocation11 + $0x80] ss:$8 sps:$4 sm:$0xff]  }
 0x145   :  { %1288 = vmatprep.subr.bf16.mxu1 %v2318_v39  ;;  %1329 = vmatprep.subr.bf16.mxu0 %v2321_v40  ;;  %v2403_v37 = vld [vmem:[#allocation11 + $0x180] ss:$8 sps:$4 sm:$0xff]   ;;  %v2433_v39 = vld [vmem:[#allocation12 + $0x170] ss:$12 sps:$4 sm:$0xff]   ;;  %v535_v40 = vsub.s32 2, %v2781_v21 }
 0x148   :  { %1289 = vmatpush1.bf16.msra.mxu1 %v2316_v41  ;;  %1330 = vmatpush1.bf16.msra.mxu0 %v2319_v42  ;;  %v221_v41 = vld [vmem:[%s2831_s4] sm:$0xf]  ;;  %v539_v42 = vsub.s32 3, %v2781_v21 }
 0x149   :  { %1290 = vmatprep.subr.bf16.mxu1 %v2324_v43  ;;  %1331 = vmatprep.subr.bf16.mxu0 %v2327_v44  ;;  %v528_v43 = vrot.slane %v221_v41, %v2784_v22  ;;  %v536_v44 = vrot.slane %v221_v41, %v535_v40 }
 0x14c   :  { %1291 = vmatpush1.bf16.msra.mxu1 %v2322_v45  ;;  %1332 = vmatpush1.bf16.msra.mxu0 %v2325_v46  ;;  %v532_v45 = vrot.slane %v221_v41, %v2787_v24  ;;  %v540_v46 = vrot.slane %v221_v41, %v539_v42  ;;  %v2457_v41 = vld [vmem:[#allocation12 + $0xf4] ss:$12 sps:$4 sm:$0xff]   ;;  %v2458_v42 = vld [vmem:[#allocation12 + $0xf8] ss:$12 sps:$4 sm:$0xff]  }
 0x14d   :  { %1292 = vmatprep.subr.bf16.mxu1 %v2330_v47  ;;  %1333 = vmatprep.subr.bf16.mxu0 %v2333_v48 }
 0x150   :  { %1293 = vmatpush1.bf16.msra.mxu1 %v2328_v49  ;;  %1334 = vmatpush1.bf16.msra.mxu0 %v2331_v50 }
 0x151   :  { %1294 = vmatprep.subr.bf16.mxu1 %v2336_v51  ;;  %1335 = vmatprep.subr.bf16.mxu0 %v2339_v52 }
 0x154   :  { %1295 = vmatpush1.bf16.msra.mxu1 %v2334_v53  ;;  %1336 = vmatpush1.bf16.msra.mxu0 %v2337_v54 }
 0x155   :  { %1296 = vmatprep.subr.bf16.mxu1 %v2342_v55  ;;  %1337 = vmatprep.subr.bf16.mxu0 %v2345_v56 }
 0x158   :  { %1297 = vmatpush1.bf16.msra.mxu1 %v2340_v57  ;;  %1338 = vmatpush1.bf16.msra.mxu0 %v2343_v58 }
 0x159   :  { %1298 = vmatprep.subr.bf16.mxu1 %v2348_v59  ;;  %1339 = vmatprep.subr.bf16.mxu0 %v2351_v60 }
 0x15c   :  { %1299 = vmatpush1.bf16.msra.mxu1 %v2346_v61  ;;  %1340 = vmatpush1.bf16.msra.mxu0 %v2349_v62 }
 0x15d   :  { %1300 = vmatprep.subr.bf16.mxu1 %v2354_v63  ;;  %1341 = vmatprep.subr.bf16.mxu0 %v2357_v0 }
 0x160   :  { %1301 = vmatpush1.bf16.msra.mxu1 %v2352_v1  ;;  %1342 = vmatpush1.bf16.msra.mxu0 %v2355_v2  ;;  %v2406_v1 = vld [vmem:[#allocation12 + $0xa8] ss:$12 sps:$4 sm:$0xff]   ;;  %v2434_v2 = vld [vmem:[#allocation12 + $0xb0] ss:$12 sps:$4 sm:$0xff]  }
 0x161   :  { %1302 = vmatprep.subr.bf16.mxu1 %v2360_v3  ;;  %1343 = vmatprep.subr.bf16.mxu0 %v2363_v4 }
 0x164   :  { %1303 = vmatpush2.bf16.msra.mxu1 %v2358_v5  ;;  %1344 = vmatpush2.bf16.msra.mxu0 %v2361_v6  ;;  %v2411_v5 = vld [vmem:[#allocation12 + $0x94] ss:$12 sps:$4 sm:$0xff]   ;;  %v2438_v6 = vld [vmem:[#allocation12 + $0x158] ss:$12 sps:$4 sm:$0xff]  }
 0x165   :  { %1304 = vmatprep.subr.bf16.mxu1 %v2366_v7  ;;  %1345 = vmatprep.subr.bf16.mxu0 %v2369_v8  ;;  %v2409_v7 = vld [vmem:[#allocation12 + $0x90] ss:$12 sps:$4 sm:$0xff]   ;;  %v2439_v8 = vld [vmem:[#allocation12 + $0x98] ss:$12 sps:$4 sm:$0xff]  }
 0x168   :  { %1305 = vmatpush2.bf16.msra.mxu1 %v2364_v9  ;;  %1346 = vmatpush2.bf16.msra.mxu0 %v2367_v10  ;;  %v2414_v9 = vld [vmem:[#allocation12 + $0x7c] ss:$12 sps:$4 sm:$0xff]   ;;  %v2443_v10 = vld [vmem:[#allocation12 + $0x140] ss:$12 sps:$4 sm:$0xff]  }
 0x169   :  { %1306 = vmatprep.subr.bf16.mxu1 %v2372_v11  ;;  %1347 = vmatprep.subr.bf16.mxu0 %v2375_v12  ;;  %v2412_v11 = vld [vmem:[#allocation12 + $0x78] ss:$12 sps:$4 sm:$0xff]   ;;  %v2444_v12 = vld [vmem:[#allocation12 + $0x80] ss:$12 sps:$4 sm:$0xff]  }
 0x16c   :  { %1307 = vmatpush2.bf16.msra.mxu1 %v2370_v13  ;;  %1348 = vmatpush2.bf16.msra.mxu0 %v2373_v14  ;;  %v2417_v13 = vld [vmem:[#allocation12 + $0x64] ss:$12 sps:$4 sm:$0xff]   ;;  %v2448_v14 = vld [vmem:[#allocation12 + $0x128] ss:$12 sps:$4 sm:$0xff]  }
 0x16d   :  { %1308 = vmatprep.subr.bf16.mxu1 %v2378_v15  ;;  %1349 = vmatprep.subr.bf16.mxu0 %v2381_v16  ;;  %v2415_v15 = vld [vmem:[#allocation12 + $0x60] ss:$12 sps:$4 sm:$0xff]   ;;  %v2449_v16 = vld [vmem:[#allocation12 + $0x68] ss:$12 sps:$4 sm:$0xff]  }
 0x170   :  { %1309 = vmatpush2.bf16.msra.mxu1 %v2376_v17  ;;  %1350 = vmatpush2.bf16.msra.mxu0 %v2379_v18  ;;  %v2420_v17 = vld [vmem:[#allocation12 + $0x4c] ss:$12 sps:$4 sm:$0xff]   ;;  %v2453_v18 = vld [vmem:[#allocation12 + $0x110] ss:$12 sps:$4 sm:$0xff]  }
 0x171   :  { %1310 = vmatprep.subr.bf16.mxu1 %v2384_v19  ;;  %1351 = vmatprep.subr.bf16.mxu0 %v2387_v20  ;;  %v2418_v19 = vld [vmem:[#allocation12 + $0x48] ss:$12 sps:$4 sm:$0xff]   ;;  %v2454_v20 = vld [vmem:[#allocation12 + $0x50] ss:$12 sps:$4 sm:$0xff]  }
 0x174   :  { %1311 = vmatpush2.bf16.msra.mxu1 %v2382_v23  ;;  %1352 = vmatpush2.bf16.msra.mxu0 %v2385_v25  ;;  %v2423_v23 = vld [vmem:[#allocation12 + $0x34] ss:$12 sps:$4 sm:$0xff]   ;;  %v2421_v25 = vld [vmem:[#allocation12 + $0x30] ss:$12 sps:$4 sm:$0xff]  }
 0x175   :  { %1312 = vmatprep.subr.bf16.mxu1 %v2390_v26  ;;  %1353 = vmatprep.subr.bf16.mxu0 %v2393_v27  ;;  %v2426_v26 = vld [vmem:[#allocation12 + $0x1c] ss:$12 sps:$4 sm:$0xff]   ;;  %v2424_v27 = vld [vmem:[#allocation12 + $0x18] ss:$12 sps:$4 sm:$0xff]  }
 0x178   :  { %1313 = vmatpush2.bf16.msra.mxu1 %v2388_v28  ;;  %1354 = vmatpush2.bf16.msra.mxu0 %v2391_v29  ;;  %v2429_v28 = vld [vmem:[#allocation12 + $0x4] ss:$12 sps:$4 sm:$0xff]   ;;  %v2427_v29 = vld [vmem:[#allocation12] ss:$12 sps:$4 sm:$0xff]  }
 0x179   :  { %1314 = vmatprep.subr.bf16.mxu1 %v2396_v30  ;;  %1355 = vmatprep.subr.bf16.mxu0 %v2399_v31  ;;  %v2432_v30 = vld [vmem:[#allocation12 + $0x16c] ss:$12 sps:$4 sm:$0xff]   ;;  %v2430_v31 = vld [vmem:[#allocation12 + $0x168] ss:$12 sps:$4 sm:$0xff]  }
 0x17c   :  { %1315 = vmatpush2.bf16.msra.mxu1 %v2394_v32  ;;  %1356 = vmatpush2.bf16.msra.mxu0 %v2397_v33  ;;  %v2437_v32 = vld [vmem:[#allocation12 + $0x154] ss:$12 sps:$4 sm:$0xff]   ;;  %v2435_v33 = vld [vmem:[#allocation12 + $0x150] ss:$12 sps:$4 sm:$0xff]  }
 0x17d   :  { %1316 = vmatprep.subr.bf16.mxu1 %v2402_v34  ;;  %1357 = vmatprep.subr.bf16.mxu0 %v2405_v35  ;;  %v2442_v34 = vld [vmem:[#allocation12 + $0x13c] ss:$12 sps:$4 sm:$0xff]   ;;  %v2440_v35 = vld [vmem:[#allocation12 + $0x138] ss:$12 sps:$4 sm:$0xff]  }
 0x180   :  { %1317 = vmatpush2.bf16.msra.mxu1 %v2400_v36  ;;  %1358 = vmatpush2.bf16.msra.mxu0 %v2403_v37  ;;  %v2447_v36 = vld [vmem:[#allocation12 + $0x124] ss:$12 sps:$4 sm:$0xff]   ;;  %v2445_v37 = vld [vmem:[#allocation12 + $0x120] ss:$12 sps:$4 sm:$0xff]  }
 0x181   :  { %1644 = vmatprep.subr.bf16.mxu1 %v2408_v38  ;;  %2129 = vmatprep.subr.bf16.mxu0 %v2433_v39  ;;  %v2452_v38 = vld [vmem:[#allocation12 + $0x10c] ss:$12 sps:$4 sm:$0xff]   ;;  %v2450_v39 = vld [vmem:[#allocation12 + $0x108] ss:$12 sps:$4 sm:$0xff]  }
 0x203   :  { %v899_v47 = vpop.f32.mrf.mxu1  ;;  %v940_v48 = vpop.f32.mrf.mxu0 }
 0x204   :  { %v900_v49 = vadd.f32 %v899_v47, %v528_v43  ;;  %v941_v50 = vadd.f32 %v940_v48, %v536_v44  ;;  %v2455_v43 = vld [vmem:[#allocation12 + $0xf0] ss:$12 sps:$4 sm:$0xff]   ;;  %v2459_v44 = vld [vmem:[#allocation12 + $0x38] ss:$12 sps:$4 sm:$0xff]   ;;  %v2464_v48 = vld [vmem:[#allocation12 + $0x20] ss:$12 sps:$4 sm:$0xff]  }
 0x205   :  { %v901_v51 = vpop.f32.mrf.mxu1  ;;  %v942_v52 = vpop.f32.mrf.mxu0  ;;  %v2460_v47 = vld [vmem:[#allocation12 + $0xd8] ss:$12 sps:$4 sm:$0xff]  }
 0x206   :  { %v902_v53 = vadd.f32 %v901_v51, %v532_v45  ;;  %v943_v54 = vadd.f32 %v942_v52, %v540_v46  ;;  %v947_v55 = vmax.f32 %v900_v49, 0.0  ;;  %v949_v56 = vmax.f32 %v941_v50, 0.0  ;;  %v2462_v45 = vld [vmem:[#allocation12 + $0xdc] ss:$12 sps:$4 sm:$0xff]   ;;  %v2463_v46 = vld [vmem:[#allocation12 + $0xe0] ss:$12 sps:$4 sm:$0xff]  }
 0x207   :  { %v903_v57 = vpop.f32.mrf.mxu1  ;;  %v944_v58 = vpop.f32.mrf.mxu0  ;;  %v2467_v49 = vld [vmem:[#allocation12 + $0xc4] ss:$12 sps:$4 sm:$0xff]   ;;  %v2468_v50 = vld [vmem:[#allocation12 + $0xc8] ss:$12 sps:$4 sm:$0xff]   ;;  %v2465_v51 = vld [vmem:[#allocation12 + $0xc0] ss:$12 sps:$4 sm:$0xff]  }
 0x208   :  { %v948_v59 = vmax.f32 %v902_v53, 0.0  ;;  %v950_v60 = vmax.f32 %v943_v54, 0.0  ;;  %v951_v3 = vpack.c.bf16 %v947_v55, %v947_v55  ;;  %v953_v4 = vpack.c.bf16 %v949_v56, %v949_v56  ;;  %v2469_v52 = vld [vmem:[#allocation12 + $0x8] ss:$12 sps:$4 sm:$0xff]   ;;  %v2470_v53 = vld [vmem:[#allocation14 + $0x78] sm:$0xff]  }
 0x209   :  { %v904_v61 = vpop.f32.mrf.mxu1  ;;  %v945_v62 = vpop.f32.mrf.mxu0  ;;  %v286_v54 = vld [vmem:[%s2833_s6] sm:$0x3] }
 0x20a   :  { %v952_v63 = vpack.c.bf16 %v948_v59, %v948_v59  ;;  %v954_v0 = vpack.c.bf16 %v950_v60, %v950_v60  ;;  %v959_v55 = vrot.slane %v286_v54, %v2784_v22  ;;  %v963_v56 = vrot.slane %v286_v54, %v2787_v24 }
 0x20c   :  { %1318 = vmatprep.mubr.bf16.mxu1 %v952_v63  ;;  %1359 = vmatprep.mubr.bf16.mxu0 %v954_v0 }
 0x20d   :  { %1319 = vmatmul.mubr.bf16.vlgmr.msra.gmra.mxu1 %v951_v3  ;;  %1360 = vmatmul.mubr.bf16.vlgmr.msra.gmra.mxu0 %v953_v4 }
 0x20e   :  { %1645 = vmatpush1.bf16.msra.mxu1 %v2406_v1  ;;  %2130 = vmatpush3.bf16.msra.mxu0 %v2434_v2 }
 0x20f   :  { %1646 = vmatprep.subr.bf16.mxu1 %v2411_v5  ;;  %2131 = vmatprep.subr.bf16.mxu0 %v2438_v6 }
 0x212   :  { %1647 = vmatpush1.bf16.msra.mxu1 %v2409_v7  ;;  %2132 = vmatpush3.bf16.msra.mxu0 %v2439_v8  ;;  %v2471_v8 = vld [vmem:[#allocation14 + $0x38] sm:$0xff]  }
 0x213   :  { %1648 = vmatprep.subr.bf16.mxu1 %v2414_v9  ;;  %2133 = vmatprep.subr.bf16.mxu0 %v2443_v10  ;;  %v2472_v10 = vld [vmem:[#allocation14 + $0x70] sm:$0xff]  }
 0x216   :  { %1649 = vmatpush1.bf16.msra.mxu1 %v2412_v11  ;;  %2134 = vmatpush3.bf16.msra.mxu0 %v2444_v12  ;;  %v2473_v11 = vld [vmem:[#allocation14 + $0x30] sm:$0xff]   ;;  %v2474_v12 = vld [vmem:[#allocation14 + $0x68] sm:$0xff]  }
 0x217   :  { %1650 = vmatprep.subr.bf16.mxu1 %v2417_v13  ;;  %2135 = vmatprep.subr.bf16.mxu0 %v2448_v14  ;;  %v2475_v13 = vld [vmem:[#allocation14 + $0x28] sm:$0xff]   ;;  %v2476_v14 = vld [vmem:[#allocation14 + $0x60] sm:$0xff]  }
 0x21a   :  { %1651 = vmatpush1.bf16.msra.mxu1 %v2415_v15  ;;  %2136 = vmatpush3.bf16.msra.mxu0 %v2449_v16  ;;  %v2477_v15 = vld [vmem:[#allocation14 + $0x20] sm:$0xff]   ;;  %v2478_v16 = vld [vmem:[#allocation14 + $0x58] sm:$0xff]  }
 0x21b   :  { %1652 = vmatprep.subr.bf16.mxu1 %v2420_v17  ;;  %2137 = vmatprep.subr.bf16.mxu0 %v2453_v18  ;;  %v2479_v17 = vld [vmem:[#allocation14 + $0x18] sm:$0xff]   ;;  %v2480_v18 = vld [vmem:[#allocation14 + $0x50] sm:$0xff]  }
 0x21e   :  { %1653 = vmatpush1.bf16.msra.mxu1 %v2418_v19  ;;  %2138 = vmatpush3.bf16.msra.mxu0 %v2454_v20  ;;  %v2481_v19 = vld [vmem:[#allocation14 + $0x10] sm:$0xff]   ;;  %v2482_v20 = vld [vmem:[#allocation14 + $0x48] sm:$0xff]  }
 0x21f   :  { %1654 = vmatprep.subr.bf16.mxu1 %v2423_v23  ;;  %2139 = vmatprep.subr.bf16.mxu0 %v2458_v42  ;;  %v2483_v23 = vld [vmem:[#allocation14 + $0x8] sm:$0xff]  }
 0x222   :  { %1655 = vmatpush1.bf16.msra.mxu1 %v2421_v25  ;;  %2140 = vmatpush3.bf16.msra.mxu0 %v2459_v44  ;;  %v2484_v25 = vld [vmem:[#allocation14 + $0x40] sm:$0xff]  }
 0x223   :  { %1656 = vmatprep.subr.bf16.mxu1 %v2426_v26  ;;  %2141 = vmatprep.subr.bf16.mxu0 %v2463_v46  ;;  %v2485_v26 = vld [vmem:[#allocation14] sm:$0xff]  }
 0x226   :  { %1657 = vmatpush1.bf16.msra.mxu1 %v2424_v27  ;;  %2142 = vmatpush3.bf16.msra.mxu0 %v2464_v48  ;;  %v351_v27 = vld [vmem:[%s2835_s8] sm:$0x7] }
 0x227   :  { %1658 = vmatprep.subr.bf16.mxu1 %v2429_v28  ;;  %2143 = vmatprep.subr.bf16.mxu0 %v2468_v50  ;;  %v1376_v28 = vrot.slane %v351_v27, %v2784_v22  ;;  %v2128_v22 = vld [vmem:[%s2838_s11] ss:$0 sm:$0xff] }
 0x22a   :  { %1659 = vmatpush1.bf16.msra.mxu1 %v2427_v29  ;;  %2144 = vmatpush3.bf16.msra.mxu0 %v2469_v52  ;;  %v1380_v29 = vrot.slane %v351_v27, %v2787_v24 }
 0x22b   :  { %1660 = vmatprep.subr.bf16.mxu1 %v2432_v30  ;;  %2151 = vmatprep.subr.bf16.mxu0 %v2470_v53  ;;  %v2111_v53 = vld [vmem:[%s2837_s10] ss:$0 sm:$0xff] }
 0x22e   :  { %1661 = vmatpush2.bf16.msra.mxu1 %v2430_v31 }
 0x22f   :  { %1662 = vmatprep.subr.bf16.mxu1 %v2437_v32 }
 0x232   :  { %1663 = vmatpush2.bf16.msra.mxu1 %v2435_v33  ;;  %v1384_v33 = vrot.slane %v351_v27, %v535_v40  ;;  %v1892_v40 = vstv %s2839_s12  ;;  %s2678_s12 = smov [#allocation15]  }
 0x233   :  { %1664 = vmatprep.subr.bf16.mxu1 %v2442_v34 }
 0x236   :  { %1665 = vmatpush2.bf16.msra.mxu1 %v2440_v35 }
 0x237   :  { %1666 = vmatprep.subr.bf16.mxu1 %v2447_v36 }
 0x23a   :  { %1667 = vmatpush2.bf16.msra.mxu1 %v2445_v37 }
 0x23b   :  { %1668 = vmatprep.subr.bf16.mxu1 %v2452_v38 }
 0x23e   :  { %1669 = vmatpush2.bf16.msra.mxu1 %v2450_v39 }
 0x23f   :  { %1670 = vmatprep.subr.bf16.mxu1 %v2457_v41 }
 0x242   :  { %1671 = vmatpush2.bf16.msra.mxu1 %v2455_v43 }
 0x243   :  { %1672 = vmatprep.subr.bf16.mxu1 %v2462_v45 }
 0x246   :  { %1673 = vmatpush2.bf16.msra.mxu1 %v2460_v47 }
 0x247   :  { %1674 = vmatprep.subr.bf16.mxu1 %v2467_v49 }
 0x24a   :  { %1675 = vmatpush2.bf16.msra.mxu1 %v2465_v51 }
 0x2cd   :  { %v1320_v57 = vpop.f32.mrf.mxu1  ;;  %v1361_v58 = vpop.f32.mrf.mxu0 }
 0x2ce   :  { %v1321_v59 = vadd.f32 %v1320_v57, %v959_v55 }
 0x2cf   :  { %v1322_v60 = vpop.f32.mrf.mxu1  ;;  %v1363_v61 = vpop.f32.mrf.mxu0 }
 0x2d0   :  { %v1362_v62 = vadd.f32 %v1361_v58, %v1321_v59  ;;  %v1323_v63 = vadd.f32 %v1322_v60, %v963_v56 }
 0x2d1   :  { %v1324_v0 = vpop.f32.mrf.mxu1  ;;  %v1365_v1 = vpop.f32.mrf.mxu0 }
 0x2d2   :  { %v1364_v2 = vadd.f32 %v1363_v61, %v1323_v63  ;;  %v1368_v3 = vmax.f32 %v1362_v62, 0.0 }
 0x2d3   :  { %v1325_v4 = vpop.f32.mrf.mxu1  ;;  %v1366_v5 = vpop.f32.mrf.mxu0 }
 0x2d4   :  { %v1369_v6 = vmax.f32 %v1364_v2, 0.0  ;;  %v1370_v9 = vpack.c.bf16 %v1368_v3, %v1368_v3 }
 0x2d6   :  { %v1371_v7 = vpack.c.bf16 %v1369_v6, %v1369_v6 }
 0x2d8   :  { %1676 = vmatprep.mubr.bf16.mxu1 %v1371_v7  ;;  %1717 = vmatprep.mubr.bf16.mxu0 %v1371_v7 }
 0x2d9   :  { %1677 = vmatmul.mubr.bf16.vlgmr.msra.gmra.mxu1 %v1370_v9  ;;  %1718 = vmatmul.mubr.bf16.vlgmr.msra.gmra.mxu0 %v1370_v9 }
 0x2da   :  { %2152 = vmatpush3.bf16.msra.mxu0 %v2471_v8 }
 0x2db   :  { %2153 = vmatprep.subr.bf16.mxu0 %v2472_v10 }
 0x2de   :  { %2154 = vmatpush3.bf16.msra.mxu0 %v2473_v11 }
 0x2df   :  { %2155 = vmatprep.subr.bf16.mxu0 %v2474_v12 }
 0x2e2   :  { %2156 = vmatpush3.bf16.msra.mxu0 %v2475_v13 }
 0x2e3   :  { %2157 = vmatprep.subr.bf16.mxu0 %v2476_v14 }
 0x2e6   :  { %2158 = vmatpush3.bf16.msra.mxu0 %v2477_v15 }
 0x2e7   :  { %2159 = vmatprep.subr.bf16.mxu0 %v2478_v16 }
 0x2ea   :  { %2160 = vmatpush3.bf16.msra.mxu0 %v2479_v17 }
 0x2eb   :  { %2161 = vmatprep.subr.bf16.mxu0 %v2480_v18 }
 0x2ee   :  { %2162 = vmatpush3.bf16.msra.mxu0 %v2481_v19 }
 0x2ef   :  { %2163 = vmatprep.subr.bf16.mxu0 %v2482_v20 }
 0x2f2   :  { %2164 = vmatpush3.bf16.msra.mxu0 %v2483_v23 }
 0x2f3   :  { %2165 = vmatprep.subr.bf16.mxu0 %v2484_v25 }
 0x2f6   :  { %2166 = vmatpush3.bf16.msra.mxu0 %v2485_v26 }
 0x399   :  { %v1678_v30 = vpop.f32.mrf.mxu1  ;;  %v2145_v31 = vpop.f32.mrf.mxu0 }
 0x39a   :  { %v1679_v32 = vadd.f32 %v1678_v30, %v1376_v28 }
 0x39b   :  { %v1680_v34 = vpop.f32.mrf.mxu1  ;;  %v2146_v35 = vpop.f32.mrf.mxu0 }
 0x39c   :  { %v1681_v36 = vadd.f32 %v1680_v34, %v1380_v29  ;;  %v2147_v37 = vadd.f32 %v2146_v35, %v2145_v31  ;;  %v1725_v38 = vmax.f32 %v1679_v32, 0.0 }
 0x39d   :  { %v1682_v39 = vpop.f32.mrf.mxu1  ;;  %v2148_v41 = vpop.f32.mrf.mxu0 }
 0x39e   :  { %v1726_v42 = vmax.f32 %v1681_v36, 0.0  ;;  %v1720_v43 = vadd.f32 %v2147_v37, %v1384_v33  ;;  %v1728_v47 = vpack.c.bf16 %v1725_v38, %v1725_v38 }
 0x39f   :  { %v1683_v44 = vpop.f32.mrf.mxu1  ;;  %v2149_v45 = vpop.f32.mrf.mxu0 }
 0x3a0   :  { %v1729_v24 = vpack.c.bf16 %v1726_v42, %v1726_v42  ;;  %v1727_v46 = vmax.f32 %v1720_v43, 0.0 }
 0x3a2   :  { %1864 = vmatprep.mubr.bf16.mxu0 %v1729_v24  ;;  %v1889_v21 = vmul.f32 %v2128_v22, %v1727_v46 }
 0x3a3   :  { %1865 = vmatmul.mubr.bf16.vlgmr.msra.gmra.mxu0 %v1728_v47 }
 0x3a4   :  { %1890 = vadd.xlane.f32.xlu1 %v1889_v21 }
 0x42d   :  { %v1891_v48 = vpop.xlane.xlu1 %1890 }
 0x42e   :  { %v1893_v49 = vadd.f32 %v1892_v40, %v1891_v48 }
 0x430   :  { %2486 = vtanh.f32 %v1893_v49 }
 0x43d   :  { %v2487_v50 = vpop.eup %2486 }
 0x43e   :  { %1896 = vst.msk [vmem:[%s2841_s14] sm:$0xff] %vm1895_vm0, %v2487_v50  ;;  %s1903_s14 = sshll.u32 %s2678_s12, 4  ;;  %s1904_s14 = int_to_ptr.vmem [resolvable:$true] %s1903_s14 }
 0x43f   :  { %s2632_s10 = scalar_lea.vmem %s1904_s14, 64  ;;  %p2637_p8 = scmp.lt.s32.totalorder %s1904_s14, %s1904_s14 }
 0x440   :  { %p2633_p7 = scmp.ne.s32.totalorder %s1904_s14, %s2632_s10  ;;  %p2638_p9 = scmp.lt.s32.totalorder %s2632_s10, %s2632_s10 }
 0x442   :  { %p2639_p10 = por %p2638_p9, %p2637_p8 }
 0x444   :  { %p2640_p11 = pnand %p2639_p10, %p2633_p7 }
 0x463   :  { %v2167_v51 = vpop.f32.mrf.mxu0 }
 0x465   :  { %v2168_v52 = vpop.f32.mrf.mxu0 }
 0x466   :  { %v2169_v54 = vadd.f32 %v2168_v52, %v2167_v51 }
 0x467   :  { %v2170_v55 = vpop.f32.mrf.mxu0 }
 0x468   :  { %v1867_v56 = vadd.f32 %v2169_v54, %v2111_v53 }
 0x469   :  { %v2171_v57 = vpop.f32.mrf.mxu0 }
 0x46a   :  { %1872 = vmax.xlane.f32.xlu0 %v1867_v56 }
 0x4f3   :  { %v1873_v58 = vpop.xlane.xlu0 %1872 }
 0x4f4   :  { %v1874_v59 = vsub.f32 %v1867_v56, %v1873_v58 }
 0x4f6   :  { %v1875_v60 = vmul.f32 1.442695, %v1874_v59 }
 0x4f8   :  { %2488 = vpow2.f32 %v1875_v60 }
 0x505   :  { %v2489_v61 = vpop.eup %2488 }
 0x506   :  { %1877 = vadd.xlane.f32.xlu0 %v2489_v61 }
 0x58f   :  { %v1878_v62 = vpop.xlane.xlu0 %1877 }
 0x590   :  { %2490 = vrcp.f32 %v1878_v62 }
 0x59d   :  { %v2491_v63 = vpop.eup %2490 }
 0x59e   :  { %v1880_v0 = vmul.f32 %v2491_v63, %v2489_v61 }
 0x5a0   :  { %v1881_v1 = vpack.c.bf16 %v1880_v0, %v1880_v0 }
 0x5a2   :  { %1882 = vst [vmem:[#allocation15] sm:$0xf] %v1881_v1 }
 0x5a3   :  { %2643 = shalt.err (!%p2640_p11)
}
 0x5a4   :  { %1906 = dma.vmem_to_hbm [thread:$0]  %s1904_s14, 64, %s2840_s13, [#allocation5]  }
 0x5a5   :  { %2660 = dma.done.wait [#allocation5], 64  }
 0x5a6   :  { %2661 = vsyncadd [#allocation5], 4294967232 }
 0x5a7   :  { %1914 = vsyncpa [#allocation4], 1 }
 0x5a8   :  { %1915 = vsyncpa [#allocation7], 1 }
 0x5a9   :  { %1916 = vsyncpa [#allocation10], 1 }
 0x5aa   :  { %1917 = vsyncpa [#allocation13], 1 }
 0x5ab   :  { %1918 = vsyncpa [#allocation5], 1 }

</bundles_post_ra>
